<compile_context>
chip_gen: v6e
topology: v6e:2x2x1
jax: 0.10.0
libtpu: 0.0.40
codegen_flags: <defaults>
</compile_context>

<pallas_src>
import jax
import jax.numpy as jnp
from jax.experimental import pallas as pl
from jax.experimental.pallas import tpu as pltpu

LANE = 128   # lane quantum: all output-channel dims padded to this
SUB = 16     # bf16 sublane quantum: node dim / input-channel dim padded to this


def _rup(x, m):
    return ((x + m - 1) // m) * m


def _cpad(c):
    return _rup(c, LANE)


# --------------------------- plan + parameter packing ----------------------- #

def build_plan(params, input_dim, hidden_dims, output_dim):
    """Walk the module structure once; emit a static step list plus the packed
    (stacked, padded) weight / bias operands the fused kernel consumes."""
    ws, bs, steps = [], [], []

    def add_w(w):
        ws.append(jnp.asarray(w, jnp.float32))
        return len(ws) - 1

    def add_b(b):
        bs.append(jnp.asarray(b, jnp.float32))
        return len(bs) - 1

    n_levels = len(hidden_dims)
    hd_rev = list(reversed(hidden_dims))

    act = _rup(input_dim, SUB)  # padded width of the running activation
    for lvl, hdim in enumerate(hidden_dims):            # ---- encoder ----
        enc, pool = params["enc"][lvl], params["pool"][lvl]
        steps.append(dict(kind="gcn", w=add_w(enc["w1"]), b=add_b(enc["b1"]),
                          ci=act, co=_cpad(hdim)))
        act = _cpad(hdim)
        steps.append(dict(kind="gcn", w=add_w(enc["w2"]), b=add_b(enc["b2"]),
                          ci=act, co=_cpad(hdim)))
        steps.append(dict(kind="push_skip", lvl=lvl, c=act))
        steps.append(dict(kind="dense", w=add_w(pool["w"]), b=add_b(pool["b"]),
                          ci=act, co=_cpad(hdim // 2), fn="relu"))
        act = _cpad(hdim // 2)

    bt = params["bottleneck"]                            # ---- bottleneck ----
    steps.append(dict(kind="gcn", w=add_w(bt["w1"]), b=add_b(bt["b1"]),
                      ci=act, co=_cpad(hidden_dims[-1])))
    act = _cpad(hidden_dims[-1])
    steps.append(dict(kind="gcn", w=add_w(bt["w2"]), b=add_b(bt["b2"]),
                      ci=act, co=act))

    for i in range(n_levels - 1):                        # ---- decoder ----
        up, dec = params["upconv"][i], params["dec"][i]
        c_up = hd_rev[i] // 2
        steps.append(dict(kind="dense", w=add_w(up["w"]), b=add_b(up["b"]),
                          ci=act, co=_cpad(c_up), fn="relu"))
        act = _cpad(c_up)
        # cat([x_up, skip]) @ W1 == x_up @ W1[:c_up] + skip @ W1[c_up:]
        steps.append(dict(kind="gcn_split",
                          w_up=add_w(dec["w1"][:c_up]),
                          w_skip=add_w(dec["w1"][c_up:]),
                          b=add_b(dec["b1"]),
                          ci_up=act, ci_skip=_cpad(hd_rev[i]),
                          lvl=n_levels - 1 - i, co=_cpad(c_up)))
        act = _cpad(c_up)
        steps.append(dict(kind="gcn", w=add_w(dec["w2"]), b=add_b(dec["b2"]),
                          ci=act, co=_cpad(c_up)))

    steps.append(dict(kind="dense", w=add_w(params["out"]["w"]),
                      b=add_b(params["out"]["b"]),
                      ci=act, co=_cpad(output_dim), fn="sigmoid"))

    # stack dims = max padded contraction / output widths over all steps
    ci_max, co_max, skip_cmax = SUB, LANE, SUB
    for s in steps:
        if s["kind"] in ("gcn", "dense"):
            ci_max = max(ci_max, s["ci"]); co_max = max(co_max, s["co"])
        elif s["kind"] == "gcn_split":
            ci_max = max(ci_max, s["ci_up"], s["ci_skip"])
            co_max = max(co_max, s["co"])
        elif s["kind"] == "push_skip":
            skip_cmax = max(skip_cmax, s["c"])

    w_stack = jnp.stack(
        [jnp.pad(w, ((0, ci_max - w.shape[0]), (0, co_max - w.shape[1])))
         for w in ws]).astype(jnp.bfloat16)                    # (n_w, CI, CO)
    b_stack = jnp.stack(
        [jnp.pad(b, (0, co_max - b.shape[0])).reshape(1, co_max)
         for b in bs]).astype(jnp.float32)                      # (n_b, 1, CO)

    dims = dict(ci_max=ci_max, co_max=co_max, skip_cmax=skip_cmax,
                n_levels=n_levels, n_w=len(ws), n_b=len(bs))
    return steps, w_stack, b_stack, dims


# ----------------------------- fused Pallas kernel -------------------------- #

def make_kernel(steps, dims):
    ci_max, co_max, skip_cmax = dims["ci_max"], dims["co_max"], dims["skip_cmax"]

    def kernel(a_ref, x_ref, w_ref, b_ref, o_ref, skip_ref):
        def mm(p, q):  # bf16 operands, f32 accumulation on the MXU
            return jnp.dot(p, q, preferred_element_type=jnp.float32)

        def load_w(i, ci, co):  # static index + static slice -> zero-cost view
            if ci == ci_max and co == co_max:
                return w_ref[i]
            return w_ref[i, 0:ci, 0:co]

        def load_b(i, co):
            b = b_ref[i]                       # (1, co_max) f32
            return b if co == co_max else b[:, 0:co]

        a = a_ref[...]                         # (n_pad, n_pad) bf16 A_hat
        h = x_ref[...]                         # (n_pad, c_in_pad) bf16 features

        for s in steps:
            k = s["kind"]
            if k == "gcn":                                   # A_hat @ (XW) + b, ReLU
                xw = mm(h, load_w(s["w"], s["ci"], s["co"])).astype(jnp.bfloat16)
                h = jnp.maximum(mm(a, xw) + load_b(s["b"], s["co"]),
                                0.0).astype(jnp.bfloat16)
            elif k == "push_skip":                           # stage skip in VMEM scratch
                if s["c"] == skip_cmax:
                    skip_ref[s["lvl"]] = h
                else:
                    skip_ref[s["lvl"], :, 0:s["c"]] = h
            elif k == "gcn_split":                           # conv1 on the "concat"
                if s["ci_skip"] == skip_cmax:
                    skip = skip_ref[s["lvl"]]
                else:
                    skip = skip_ref[s["lvl"], :, 0:s["ci_skip"]]
                xw = (mm(h, load_w(s["w_up"], s["ci_up"], s["co"]))
                      + mm(skip, load_w(s["w_skip"], s["ci_skip"], s["co"]))
                      ).astype(jnp.bfloat16)
                h = jnp.maximum(mm(a, xw) + load_b(s["b"], s["co"]),
                                0.0).astype(jnp.bfloat16)
            else:                                            # dense (pool/upconv/head)
                out = mm(h, load_w(s["w"], s["ci"], s["co"])) + load_b(s["b"], s["co"])
                if s["fn"] == "relu":
                    h = jnp.maximum(out, 0.0).astype(jnp.bfloat16)
                else:                                        # final sigmoid head (f32)
                    o_ref[...] = jax.nn.sigmoid(out)

    return kernel


# --------------------------------- JAX glue --------------------------------- #

def build_norm_adj(edge_index, num_nodes):
    """D^-1/2 (A + I) D^-1/2 exactly as torch_geometric GCNConv normalizes."""
    src, dst = edge_index[0], edge_index[1]
    a = jnp.zeros((num_nodes, num_nodes), jnp.float32).at[dst, src].set(1.0)
    a = a + jnp.eye(num_nodes, dtype=jnp.float32)
    deg = a.sum(axis=1)
    dinv = jax.lax.rsqrt(deg)
    return a * dinv[:, None] * dinv[None, :]


def _glorot(key, c_in, c_out):
    scale = jnp.sqrt(2.0 / (c_in + c_out)).astype(jnp.float32)
    return scale * jax.random.normal(key, (c_in, c_out), jnp.float32)


def init_params(key, input_dim, hidden_dims, output_dim):
    hd = list(hidden_dims)
    keys = iter(jax.random.split(key, 64))

    def gcn_pair(c_in, c_out):
        return {"w1": _glorot(next(keys), c_in, c_out),
                "b1": jnp.zeros((c_out,), jnp.float32),
                "w2": _glorot(next(keys), c_out, c_out),
                "b2": jnp.zeros((c_out,), jnp.float32)}

    def lin(c_in, c_out):
        return {"w": _glorot(next(keys), c_in, c_out),
                "b": 0.01 * jax.random.normal(next(keys), (c_out,), jnp.float32)}

    params = {"enc": [], "pool": [], "upconv": [], "dec": []}
    in_c = input_dim
    for h in hd:
        params["enc"].append(gcn_pair(in_c, h))
        params["pool"].append(lin(h, h // 2))
        in_c = h // 2
    params["bottleneck"] = gcn_pair(hd[-1] // 2, hd[-1])
    hd_rev = list(reversed(hd))
    for i in range(len(hd_rev) - 1):
        params["upconvs" if False else "upconv"].append(lin(hd_rev[i], hd_rev[i] // 2))
        # TODO(synk): module __init__ declares DoubleGCNConv(hidden_dims[i], hidden_dims[i]//2),
        # but forward concatenates the upconv output (H//2) with the skip (H), so the real
        # in_channels of conv1 is 3*H//2; weights are sized to the actual data flow.
        params["dec"].append({
            "w1": _glorot(next(keys), hd_rev[i] + hd_rev[i] // 2, hd_rev[i] // 2),
            "b1": jnp.zeros((hd_rev[i] // 2,), jnp.float32),
            "w2": _glorot(next(keys), hd_rev[i] // 2, hd_rev[i] // 2),
            "b2": jnp.zeros((hd_rev[i] // 2,), jnp.float32)})
    params["out"] = lin(hd_rev[-1] // 2, output_dim)
    return params


def make_forward(steps, dims, n, input_dim, output_dim):
    """Build the jitted forward; everything shape/plan-related is static here."""
    n_pad = _rup(n, SUB)
    c_in_pad = _rup(input_dim, SUB)
    out_pad = _cpad(output_dim)
    n_levels = dims["n_levels"]
    kernel = make_kernel(steps, dims)

    # static cost estimate derived from the plan
    flops = 0
    for s in steps:
        if s["kind"] == "gcn":
            flops += 2 * n_pad * s["ci"] * s["co"] + 2 * n_pad * n_pad * s["co"]
        elif s["kind"] == "gcn_split":
            flops += 2 * n_pad * (s["ci_up"] + s["ci_skip"]) * s["co"]
            flops += 2 * n_pad * n_pad * s["co"]
        elif s["kind"] == "dense":
            flops += 2 * n_pad * s["ci"] * s["co"]

    def nbytes(shape, dt):
        sz = 1
        for d in shape:
            sz *= d
        return sz * jnp.dtype(dt).itemsize

    io_bytes = (nbytes((n_pad, n_pad), jnp.bfloat16)
                + nbytes((n_pad, c_in_pad), jnp.bfloat16)
                + nbytes((dims["n_w"], dims["ci_max"], dims["co_max"]), jnp.bfloat16)
                + nbytes((dims["n_b"], 1, dims["co_max"]), jnp.float32)
                + nbytes((n_pad, out_pad), jnp.float32))
    scratch_bytes = nbytes((n_levels, n_pad, dims["skip_cmax"]), jnp.bfloat16)
    vmem_limit = int(max(4 << 20, 2 * (io_bytes + scratch_bytes)))

    call = pl.pallas_call(
        kernel,
        out_shape=jax.ShapeDtypeStruct((n_pad, out_pad), jnp.float32),
        in_specs=[pl.BlockSpec(memory_space=pltpu.MemorySpace.VMEM)] * 4,
        out_specs=pl.BlockSpec(memory_space=pltpu.MemorySpace.VMEM),
        scratch_shapes=[pltpu.VMEM((n_levels, n_pad, dims["skip_cmax"]),
                                   jnp.bfloat16)],
        compiler_params=pltpu.CompilerParams(vmem_limit_bytes=vmem_limit),
        cost_estimate=pl.CostEstimate(flops=int(flops),
                                      transcendentals=int(n_pad * out_pad),
                                      bytes_accessed=int(io_bytes)),
    )

    @jax.jit
    def forward(a_p, x, w_stack, b_stack):
        x_p = jnp.pad(x, ((0, n_pad - n), (0, c_in_pad - input_dim))
                      ).astype(jnp.bfloat16)
        out = call(a_p, x_p, w_stack, b_stack)
        return out[:n, :output_dim]

    return forward


# ----------------------------------- main ----------------------------------- #

if __name__ == "__main__":
    N = 64          # number of graph nodes (already a multiple of the 16 sublane quantum)
    INPUT_DIM = 16
    HIDDEN_DIMS = [64, 64]  # equal dims so the module's declared Linear in-features match the flow
    OUTPUT_DIM = 8

    key = jax.random.PRNGKey(0)
    k_x, k_p = jax.random.split(key)

    # deterministic ring graph (bidirectional edges)
    src = jnp.arange(N, dtype=jnp.int32)
    dst = (src + 1) % N
    edge_index = jnp.stack(
        [jnp.concatenate([src, dst]), jnp.concatenate([dst, src])], axis=0)

    x = jax.random.normal(k_x, (N, INPUT_DIM), jnp.float32)
    params = init_params(k_p, INPUT_DIM, HIDDEN_DIMS, OUTPUT_DIM)

    # --- one-time setup, hoisted out of the hot path ---
    n_pad = _rup(N, SUB)
    a_hat = build_norm_adj(edge_index, N)
    a_p = jnp.pad(a_hat, ((0, n_pad - N), (0, n_pad - N))).astype(jnp.bfloat16)
    steps, w_stack, b_stack, dims = build_plan(params, INPUT_DIM, HIDDEN_DIMS,
                                               OUTPUT_DIM)
    forward = make_forward(steps, dims, N, INPUT_DIM, OUTPUT_DIM)

    out = jax.block_until_ready(forward(a_p, x, w_stack, b_stack))

    assert out.shape == (N, OUTPUT_DIM)
    assert bool(jnp.all(jnp.isfinite(out)))
    assert bool(jnp.all((out >= 0.0) & (out <= 1.0)))  # sigmoid output
    print("KERNEL_OK")
</pallas_src>

<mosaic_0001>
module attributes {stable_mosaic.version = 11 : i64} {
  func.func @kernel(%arg0: memref<64x64xbf16, #tpu.memory_space<vmem>>, %arg1: memref<64x16xbf16, #tpu.memory_space<vmem>>, %arg2: memref<13x128x128xbf16, #tpu.memory_space<vmem>>, %arg3: memref<12x1x128xf32, #tpu.memory_space<vmem>>, %arg4: memref<64x128xf32, #tpu.memory_space<vmem>>, %arg5: memref<2x64x128xbf16, #tpu.memory_space<vmem>>) attributes {dimension_semantics = [], scalar_prefetch = 0 : i64, scratch_operands = 1 : i64, tpu.core_type = #tpu.core_type<tc>} {
    %c0 = arith.constant 0 : index
    %c0_0 = arith.constant 0 : index
    %0 = vector.load %arg0[%c0, %c0_0] : memref<64x64xbf16, #tpu.memory_space<vmem>>, vector<64x64xbf16>
    %c0_1 = arith.constant 0 : index
    %c0_2 = arith.constant 0 : index
    %1 = vector.load %arg1[%c0_1, %c0_2] : memref<64x16xbf16, #tpu.memory_space<vmem>>, vector<64x16xbf16>
    %c0_3 = arith.constant 0 : index
    %c0_4 = arith.constant 0 : index
    %c0_5 = arith.constant 0 : index
    %2 = vector.load %arg2[%c0_3, %c0_4, %c0_5] : memref<13x128x128xbf16, #tpu.memory_space<vmem>>, vector<1x16x128xbf16>
    %3 = vector.shape_cast %2 : vector<1x16x128xbf16> to vector<16x128xbf16>
    %cst = arith.constant dense<0.000000e+00> : vector<64x128xf32>
    %4 = tpu.matmul %1, %3, %cst {dimension_numbers = #tpu.dot_dimension_numbers<[1], [0], [0], [1], [0, 0, 1, 1], [], []>} : vector<64x16xbf16>, vector<16x128xbf16>, vector<64x128xf32> -> vector<64x128xf32>
    %5 = arith.truncf %4 : vector<64x128xf32> to vector<64x128xbf16>
    %cst_6 = arith.constant dense<0.000000e+00> : vector<64x128xf32>
    %6 = tpu.matmul %0, %5, %cst_6 {dimension_numbers = #tpu.dot_dimension_numbers<[1], [0], [0], [1], [0, 0, 1, 1], [], []>} : vector<64x64xbf16>, vector<64x128xbf16>, vector<64x128xf32> -> vector<64x128xf32>
    %c0_7 = arith.constant 0 : index
    %c0_8 = arith.constant 0 : index
    %c0_9 = arith.constant 0 : index
    %7 = vector.load %arg3[%c0_7, %c0_8, %c0_9] : memref<12x1x128xf32, #tpu.memory_space<vmem>>, vector<1x1x128xf32>
    %8 = vector.shape_cast %7 : vector<1x1x128xf32> to vector<1x128xf32>
    %9 = vector.broadcast %8 : vector<1x128xf32> to vector<64x128xf32>
    %10 = arith.addf %6, %9 : vector<64x128xf32>
    %cst_10 = arith.constant 0.000000e+00 : f32
    %11 = vector.broadcast %cst_10 : f32 to vector<64x128xf32>
    %12 = arith.maximumf %10, %11 : vector<64x128xf32>
    %13 = arith.truncf %12 : vector<64x128xf32> to vector<64x128xbf16>
    %c1 = arith.constant 1 : index
    %c0_11 = arith.constant 0 : index
    %c0_12 = arith.constant 0 : index
    %14 = vector.load %arg2[%c1, %c0_11, %c0_12] : memref<13x128x128xbf16, #tpu.memory_space<vmem>>, vector<1x128x128xbf16>
    %15 = vector.shape_cast %14 : vector<1x128x128xbf16> to vector<128x128xbf16>
    %cst_13 = arith.constant dense<0.000000e+00> : vector<64x128xf32>
    %16 = tpu.matmul %13, %15, %cst_13 {dimension_numbers = #tpu.dot_dimension_numbers<[1], [0], [0], [1], [0, 0, 1, 1], [], []>} : vector<64x128xbf16>, vector<128x128xbf16>, vector<64x128xf32> -> vector<64x128xf32>
    %17 = arith.truncf %16 : vector<64x128xf32> to vector<64x128xbf16>
    %cst_14 = arith.constant dense<0.000000e+00> : vector<64x128xf32>
    %18 = tpu.matmul %0, %17, %cst_14 {dimension_numbers = #tpu.dot_dimension_numbers<[1], [0], [0], [1], [0, 0, 1, 1], [], []>} : vector<64x64xbf16>, vector<64x128xbf16>, vector<64x128xf32> -> vector<64x128xf32>
    %c1_15 = arith.constant 1 : index
    %c0_16 = arith.constant 0 : index
    %c0_17 = arith.constant 0 : index
    %19 = vector.load %arg3[%c1_15, %c0_16, %c0_17] : memref<12x1x128xf32, #tpu.memory_space<vmem>>, vector<1x1x128xf32>
    %20 = vector.shape_cast %19 : vector<1x1x128xf32> to vector<1x128xf32>
    %21 = vector.broadcast %20 : vector<1x128xf32> to vector<64x128xf32>
    %22 = arith.addf %18, %21 : vector<64x128xf32>
    %cst_18 = arith.constant 0.000000e+00 : f32
    %23 = vector.broadcast %cst_18 : f32 to vector<64x128xf32>
    %24 = arith.maximumf %22, %23 : vector<64x128xf32>
    %25 = arith.truncf %24 : vector<64x128xf32> to vector<64x128xbf16>
    %c0_19 = arith.constant 0 : index
    %c0_20 = arith.constant 0 : index
    %c0_21 = arith.constant 0 : index
    %26 = vector.load %arg5[%c0_19, %c0_20, %c0_21] : memref<2x64x128xbf16, #tpu.memory_space<vmem>>, vector<1x64x128xbf16>
    %27 = vector.shape_cast %26 : vector<1x64x128xbf16> to vector<64x128xbf16>
    %28 = vector.shape_cast %25 : vector<64x128xbf16> to vector<1x64x128xbf16>
    tpu.vector_store %arg5[%c0_19, %c0_20, %c0_21], %28 {strides = array<i32>} : memref<2x64x128xbf16, #tpu.memory_space<vmem>>, vector<1x64x128xbf16>,
    %c2 = arith.constant 2 : index
    %c0_22 = arith.constant 0 : index
    %c0_23 = arith.constant 0 : index
    %29 = vector.load %arg2[%c2, %c0_22, %c0_23] : memref<13x128x128xbf16, #tpu.memory_space<vmem>>, vector<1x128x128xbf16>
    %30 = vector.shape_cast %29 : vector<1x128x128xbf16> to vector<128x128xbf16>
    %cst_24 = arith.constant dense<0.000000e+00> : vector<64x128xf32>
    %31 = tpu.matmul %25, %30, %cst_24 {dimension_numbers = #tpu.dot_dimension_numbers<[1], [0], [0], [1], [0, 0, 1, 1], [], []>} : vector<64x128xbf16>, vector<128x128xbf16>, vector<64x128xf32> -> vector<64x128xf32>
    %c2_25 = arith.constant 2 : index
    %c0_26 = arith.constant 0 : index
    %c0_27 = arith.constant 0 : index
    %32 = vector.load %arg3[%c2_25, %c0_26, %c0_27] : memref<12x1x128xf32, #tpu.memory_space<vmem>>, vector<1x1x128xf32>
    %33 = vector.shape_cast %32 : vector<1x1x128xf32> to vector<1x128xf32>
    %34 = vector.broadcast %33 : vector<1x128xf32> to vector<64x128xf32>
    %35 = arith.addf %31, %34 : vector<64x128xf32>
    %cst_28 = arith.constant 0.000000e+00 : f32
    %36 = vector.broadcast %cst_28 : f32 to vector<64x128xf32>
    %37 = arith.maximumf %35, %36 : vector<64x128xf32>
    %38 = arith.truncf %37 : vector<64x128xf32> to vector<64x128xbf16>
    %c3 = arith.constant 3 : index
    %c0_29 = arith.constant 0 : index
    %c0_30 = arith.constant 0 : index
    %39 = vector.load %arg2[%c3, %c0_29, %c0_30] : memref<13x128x128xbf16, #tpu.memory_space<vmem>>, vector<1x128x128xbf16>
    %40 = vector.shape_cast %39 : vector<1x128x128xbf16> to vector<128x128xbf16>
    %cst_31 = arith.constant dense<0.000000e+00> : vector<64x128xf32>
    %41 = tpu.matmul %38, %40, %cst_31 {dimension_numbers = #tpu.dot_dimension_numbers<[1], [0], [0], [1], [0, 0, 1, 1], [], []>} : vector<64x128xbf16>, vector<128x128xbf16>, vector<64x128xf32> -> vector<64x128xf32>
    %42 = arith.truncf %41 : vector<64x128xf32> to vector<64x128xbf16>
    %cst_32 = arith.constant dense<0.000000e+00> : vector<64x128xf32>
    %43 = tpu.matmul %0, %42, %cst_32 {dimension_numbers = #tpu.dot_dimension_numbers<[1], [0], [0], [1], [0, 0, 1, 1], [], []>} : vector<64x64xbf16>, vector<64x128xbf16>, vector<64x128xf32> -> vector<64x128xf32>
    %c3_33 = arith.constant 3 : index
    %c0_34 = arith.constant 0 : index
    %c0_35 = arith.constant 0 : index
    %44 = vector.load %arg3[%c3_33, %c0_34, %c0_35] : memref<12x1x128xf32, #tpu.memory_space<vmem>>, vector<1x1x128xf32>
    %45 = vector.shape_cast %44 : vector<1x1x128xf32> to vector<1x128xf32>
    %46 = vector.broadcast %45 : vector<1x128xf32> to vector<64x128xf32>
    %47 = arith.addf %43, %46 : vector<64x128xf32>
    %cst_36 = arith.constant 0.000000e+00 : f32
    %48 = vector.broadcast %cst_36 : f32 to vector<64x128xf32>
    %49 = arith.maximumf %47, %48 : vector<64x128xf32>
    %50 = arith.truncf %49 : vector<64x128xf32> to vector<64x128xbf16>
    %c4 = arith.constant 4 : index
    %c0_37 = arith.constant 0 : index
    %c0_38 = arith.constant 0 : index
    %51 = vector.load %arg2[%c4, %c0_37, %c0_38] : memref<13x128x128xbf16, #tpu.memory_space<vmem>>, vector<1x128x128xbf16>
    %52 = vector.shape_cast %51 : vector<1x128x128xbf16> to vector<128x128xbf16>
    %cst_39 = arith.constant dense<0.000000e+00> : vector<64x128xf32>
    %53 = tpu.matmul %50, %52, %cst_39 {dimension_numbers = #tpu.dot_dimension_numbers<[1], [0], [0], [1], [0, 0, 1, 1], [], []>} : vector<64x128xbf16>, vector<128x128xbf16>, vector<64x128xf32> -> vector<64x128xf32>
    %54 = arith.truncf %53 : vector<64x128xf32> to vector<64x128xbf16>
    %cst_40 = arith.constant dense<0.000000e+00> : vector<64x128xf32>
    %55 = tpu.matmul %0, %54, %cst_40 {dimension_numbers = #tpu.dot_dimension_numbers<[1], [0], [0], [1], [0, 0, 1, 1], [], []>} : vector<64x64xbf16>, vector<64x128xbf16>, vector<64x128xf32> -> vector<64x128xf32>
    %c4_41 = arith.constant 4 : index
    %c0_42 = arith.constant 0 : index
    %c0_43 = arith.constant 0 : index
    %56 = vector.load %arg3[%c4_41, %c0_42, %c0_43] : memref<12x1x128xf32, #tpu.memory_space<vmem>>, vector<1x1x128xf32>
    %57 = vector.shape_cast %56 : vector<1x1x128xf32> to vector<1x128xf32>
    %58 = vector.broadcast %57 : vector<1x128xf32> to vector<64x128xf32>
    %59 = arith.addf %55, %58 : vector<64x128xf32>
    %cst_44 = arith.constant 0.000000e+00 : f32
    %60 = vector.broadcast %cst_44 : f32 to vector<64x128xf32>
    %61 = arith.maximumf %59, %60 : vector<64x128xf32>
    %62 = arith.truncf %61 : vector<64x128xf32> to vector<64x128xbf16>
    %c1_45 = arith.constant 1 : index
    %c0_46 = arith.constant 0 : index
    %c0_47 = arith.constant 0 : index
    %63 = vector.load %arg5[%c1_45, %c0_46, %c0_47] : memref<2x64x128xbf16, #tpu.memory_space<vmem>>, vector<1x64x128xbf16>
    %64 = vector.shape_cast %63 : vector<1x64x128xbf16> to vector<64x128xbf16>
    %65 = vector.shape_cast %62 : vector<64x128xbf16> to vector<1x64x128xbf16>
    tpu.vector_store %arg5[%c1_45, %c0_46, %c0_47], %65 {strides = array<i32>} : memref<2x64x128xbf16, #tpu.memory_space<vmem>>, vector<1x64x128xbf16>,
    %c5 = arith.constant 5 : index
    %c0_48 = arith.constant 0 : index
    %c0_49 = arith.constant 0 : index
    %66 = vector.load %arg2[%c5, %c0_48, %c0_49] : memref<13x128x128xbf16, #tpu.memory_space<vmem>>, vector<1x128x128xbf16>
    %67 = vector.shape_cast %66 : vector<1x128x128xbf16> to vector<128x128xbf16>
    %cst_50 = arith.constant dense<0.000000e+00> : vector<64x128xf32>
    %68 = tpu.matmul %62, %67, %cst_50 {dimension_numbers = #tpu.dot_dimension_numbers<[1], [0], [0], [1], [0, 0, 1, 1], [], []>} : vector<64x128xbf16>, vector<128x128xbf16>, vector<64x128xf32> -> vector<64x128xf32>
    %c5_51 = arith.constant 5 : index
    %c0_52 = arith.constant 0 : index
    %c0_53 = arith.constant 0 : index
    %69 = vector.load %arg3[%c5_51, %c0_52, %c0_53] : memref<12x1x128xf32, #tpu.memory_space<vmem>>, vector<1x1x128xf32>
    %70 = vector.shape_cast %69 : vector<1x1x128xf32> to vector<1x128xf32>
    %71 = vector.broadcast %70 : vector<1x128xf32> to vector<64x128xf32>
    %72 = arith.addf %68, %71 : vector<64x128xf32>
    %cst_54 = arith.constant 0.000000e+00 : f32
    %73 = vector.broadcast %cst_54 : f32 to vector<64x128xf32>
    %74 = arith.maximumf %72, %73 : vector<64x128xf32>
    %75 = arith.truncf %74 : vector<64x128xf32> to vector<64x128xbf16>
    %c6 = arith.constant 6 : index
    %c0_55 = arith.constant 0 : index
    %c0_56 = arith.constant 0 : index
    %76 = vector.load %arg2[%c6, %c0_55, %c0_56] : memref<13x128x128xbf16, #tpu.memory_space<vmem>>, vector<1x128x128xbf16>
    %77 = vector.shape_cast %76 : vector<1x128x128xbf16> to vector<128x128xbf16>
    %cst_57 = arith.constant dense<0.000000e+00> : vector<64x128xf32>
    %78 = tpu.matmul %75, %77, %cst_57 {dimension_numbers = #tpu.dot_dimension_numbers<[1], [0], [0], [1], [0, 0, 1, 1], [], []>} : vector<64x128xbf16>, vector<128x128xbf16>, vector<64x128xf32> -> vector<64x128xf32>
    %79 = arith.truncf %78 : vector<64x128xf32> to vector<64x128xbf16>
    %cst_58 = arith.constant dense<0.000000e+00> : vector<64x128xf32>
    %80 = tpu.matmul %0, %79, %cst_58 {dimension_numbers = #tpu.dot_dimension_numbers<[1], [0], [0], [1], [0, 0, 1, 1], [], []>} : vector<64x64xbf16>, vector<64x128xbf16>, vector<64x128xf32> -> vector<64x128xf32>
    %c6_59 = arith.constant 6 : index
    %c0_60 = arith.constant 0 : index
    %c0_61 = arith.constant 0 : index
    %81 = vector.load %arg3[%c6_59, %c0_60, %c0_61] : memref<12x1x128xf32, #tpu.memory_space<vmem>>, vector<1x1x128xf32>
    %82 = vector.shape_cast %81 : vector<1x1x128xf32> to vector<1x128xf32>
    %83 = vector.broadcast %82 : vector<1x128xf32> to vector<64x128xf32>
    %84 = arith.addf %80, %83 : vector<64x128xf32>
    %cst_62 = arith.constant 0.000000e+00 : f32
    %85 = vector.broadcast %cst_62 : f32 to vector<64x128xf32>
    %86 = arith.maximumf %84, %85 : vector<64x128xf32>
    %87 = arith.truncf %86 : vector<64x128xf32> to vector<64x128xbf16>
    %c7 = arith.constant 7 : index
    %c0_63 = arith.constant 0 : index
    %c0_64 = arith.constant 0 : index
    %88 = vector.load %arg2[%c7, %c0_63, %c0_64] : memref<13x128x128xbf16, #tpu.memory_space<vmem>>, vector<1x128x128xbf16>
    %89 = vector.shape_cast %88 : vector<1x128x128xbf16> to vector<128x128xbf16>
    %cst_65 = arith.constant dense<0.000000e+00> : vector<64x128xf32>
    %90 = tpu.matmul %87, %89, %cst_65 {dimension_numbers = #tpu.dot_dimension_numbers<[1], [0], [0], [1], [0, 0, 1, 1], [], []>} : vector<64x128xbf16>, vector<128x128xbf16>, vector<64x128xf32> -> vector<64x128xf32>
    %91 = arith.truncf %90 : vector<64x128xf32> to vector<64x128xbf16>
    %cst_66 = arith.constant dense<0.000000e+00> : vector<64x128xf32>
    %92 = tpu.matmul %0, %91, %cst_66 {dimension_numbers = #tpu.dot_dimension_numbers<[1], [0], [0], [1], [0, 0, 1, 1], [], []>} : vector<64x64xbf16>, vector<64x128xbf16>, vector<64x128xf32> -> vector<64x128xf32>
    %c7_67 = arith.constant 7 : index
    %c0_68 = arith.constant 0 : index
    %c0_69 = arith.constant 0 : index
    %93 = vector.load %arg3[%c7_67, %c0_68, %c0_69] : memref<12x1x128xf32, #tpu.memory_space<vmem>>, vector<1x1x128xf32>
    %94 = vector.shape_cast %93 : vector<1x1x128xf32> to vector<1x128xf32>
    %95 = vector.broadcast %94 : vector<1x128xf32> to vector<64x128xf32>
    %96 = arith.addf %92, %95 : vector<64x128xf32>
    %cst_70 = arith.constant 0.000000e+00 : f32
    %97 = vector.broadcast %cst_70 : f32 to vector<64x128xf32>
    %98 = arith.maximumf %96, %97 : vector<64x128xf32>
    %99 = arith.truncf %98 : vector<64x128xf32> to vector<64x128xbf16>
    %c8 = arith.constant 8 : index
    %c0_71 = arith.constant 0 : index
    %c0_72 = arith.constant 0 : index
    %100 = vector.load %arg2[%c8, %c0_71, %c0_72] : memref<13x128x128xbf16, #tpu.memory_space<vmem>>, vector<1x128x128xbf16>
    %101 = vector.shape_cast %100 : vector<1x128x128xbf16> to vector<128x128xbf16>
    %cst_73 = arith.constant dense<0.000000e+00> : vector<64x128xf32>
    %102 = tpu.matmul %99, %101, %cst_73 {dimension_numbers = #tpu.dot_dimension_numbers<[1], [0], [0], [1], [0, 0, 1, 1], [], []>} : vector<64x128xbf16>, vector<128x128xbf16>, vector<64x128xf32> -> vector<64x128xf32>
    %c8_74 = arith.constant 8 : index
    %c0_75 = arith.constant 0 : index
    %c0_76 = arith.constant 0 : index
    %103 = vector.load %arg3[%c8_74, %c0_75, %c0_76] : memref<12x1x128xf32, #tpu.memory_space<vmem>>, vector<1x1x128xf32>
    %104 = vector.shape_cast %103 : vector<1x1x128xf32> to vector<1x128xf32>
    %105 = vector.broadcast %104 : vector<1x128xf32> to vector<64x128xf32>
    %106 = arith.addf %102, %105 : vector<64x128xf32>
    %cst_77 = arith.constant 0.000000e+00 : f32
    %107 = vector.broadcast %cst_77 : f32 to vector<64x128xf32>
    %108 = arith.maximumf %106, %107 : vector<64x128xf32>
    %109 = arith.truncf %108 : vector<64x128xf32> to vector<64x128xbf16>
    %c1_78 = arith.constant 1 : index
    %c0_79 = arith.constant 0 : index
    %c0_80 = arith.constant 0 : index
    %110 = vector.load %arg5[%c1_78, %c0_79, %c0_80] : memref<2x64x128xbf16, #tpu.memory_space<vmem>>, vector<1x64x128xbf16>
    %111 = vector.shape_cast %110 : vector<1x64x128xbf16> to vector<64x128xbf16>
    %c9 = arith.constant 9 : index
    %c0_81 = arith.constant 0 : index
    %c0_82 = arith.constant 0 : index
    %112 = vector.load %arg2[%c9, %c0_81, %c0_82] : memref<13x128x128xbf16, #tpu.memory_space<vmem>>, vector<1x128x128xbf16>
    %113 = vector.shape_cast %112 : vector<1x128x128xbf16> to vector<128x128xbf16>
    %cst_83 = arith.constant dense<0.000000e+00> : vector<64x128xf32>
    %114 = tpu.matmul %109, %113, %cst_83 {dimension_numbers = #tpu.dot_dimension_numbers<[1], [0], [0], [1], [0, 0, 1, 1], [], []>} : vector<64x128xbf16>, vector<128x128xbf16>, vector<64x128xf32> -> vector<64x128xf32>
    %c10 = arith.constant 10 : index
    %c0_84 = arith.constant 0 : index
    %c0_85 = arith.constant 0 : index
    %115 = vector.load %arg2[%c10, %c0_84, %c0_85] : memref<13x128x128xbf16, #tpu.memory_space<vmem>>, vector<1x128x128xbf16>
    %116 = vector.shape_cast %115 : vector<1x128x128xbf16> to vector<128x128xbf16>
    %cst_86 = arith.constant dense<0.000000e+00> : vector<64x128xf32>
    %117 = tpu.matmul %111, %116, %cst_86 {dimension_numbers = #tpu.dot_dimension_numbers<[1], [0], [0], [1], [0, 0, 1, 1], [], []>} : vector<64x128xbf16>, vector<128x128xbf16>, vector<64x128xf32> -> vector<64x128xf32>
    %118 = arith.addf %114, %117 : vector<64x128xf32>
    %119 = arith.truncf %118 : vector<64x128xf32> to vector<64x128xbf16>
    %cst_87 = arith.constant dense<0.000000e+00> : vector<64x128xf32>
    %120 = tpu.matmul %0, %119, %cst_87 {dimension_numbers = #tpu.dot_dimension_numbers<[1], [0], [0], [1], [0, 0, 1, 1], [], []>} : vector<64x64xbf16>, vector<64x128xbf16>, vector<64x128xf32> -> vector<64x128xf32>
    %c9_88 = arith.constant 9 : index
    %c0_89 = arith.constant 0 : index
    %c0_90 = arith.constant 0 : index
    %121 = vector.load %arg3[%c9_88, %c0_89, %c0_90] : memref<12x1x128xf32, #tpu.memory_space<vmem>>, vector<1x1x128xf32>
    %122 = vector.shape_cast %121 : vector<1x1x128xf32> to vector<1x128xf32>
    %123 = vector.broadcast %122 : vector<1x128xf32> to vector<64x128xf32>
    %124 = arith.addf %120, %123 : vector<64x128xf32>
    %cst_91 = arith.constant 0.000000e+00 : f32
    %125 = vector.broadcast %cst_91 : f32 to vector<64x128xf32>
    %126 = arith.maximumf %124, %125 : vector<64x128xf32>
    %127 = arith.truncf %126 : vector<64x128xf32> to vector<64x128xbf16>
    %c11 = arith.constant 11 : index
    %c0_92 = arith.constant 0 : index
    %c0_93 = arith.constant 0 : index
    %128 = vector.load %arg2[%c11, %c0_92, %c0_93] : memref<13x128x128xbf16, #tpu.memory_space<vmem>>, vector<1x128x128xbf16>
    %129 = vector.shape_cast %128 : vector<1x128x128xbf16> to vector<128x128xbf16>
    %cst_94 = arith.constant dense<0.000000e+00> : vector<64x128xf32>
    %130 = tpu.matmul %127, %129, %cst_94 {dimension_numbers = #tpu.dot_dimension_numbers<[1], [0], [0], [1], [0, 0, 1, 1], [], []>} : vector<64x128xbf16>, vector<128x128xbf16>, vector<64x128xf32> -> vector<64x128xf32>
    %131 = arith.truncf %130 : vector<64x128xf32> to vector<64x128xbf16>
    %cst_95 = arith.constant dense<0.000000e+00> : vector<64x128xf32>
    %132 = tpu.matmul %0, %131, %cst_95 {dimension_numbers = #tpu.dot_dimension_numbers<[1], [0], [0], [1], [0, 0, 1, 1], [], []>} : vector<64x64xbf16>, vector<64x128xbf16>, vector<64x128xf32> -> vector<64x128xf32>
    %c10_96 = arith.constant 10 : index
    %c0_97 = arith.constant 0 : index
    %c0_98 = arith.constant 0 : index
    %133 = vector.load %arg3[%c10_96, %c0_97, %c0_98] : memref<12x1x128xf32, #tpu.memory_space<vmem>>, vector<1x1x128xf32>
    %134 = vector.shape_cast %133 : vector<1x1x128xf32> to vector<1x128xf32>
    %135 = vector.broadcast %134 : vector<1x128xf32> to vector<64x128xf32>
    %136 = arith.addf %132, %135 : vector<64x128xf32>
    %cst_99 = arith.constant 0.000000e+00 : f32
    %137 = vector.broadcast %cst_99 : f32 to vector<64x128xf32>
    %138 = arith.maximumf %136, %137 : vector<64x128xf32>
    %139 = arith.truncf %138 : vector<64x128xf32> to vector<64x128xbf16>
    %c12 = arith.constant 12 : index
    %c0_100 = arith.constant 0 : index
    %c0_101 = arith.constant 0 : index
    %140 = vector.load %arg2[%c12, %c0_100, %c0_101] : memref<13x128x128xbf16, #tpu.memory_space<vmem>>, vector<1x128x128xbf16>
    %141 = vector.shape_cast %140 : vector<1x128x128xbf16> to vector<128x128xbf16>
    %cst_102 = arith.constant dense<0.000000e+00> : vector<64x128xf32>
    %142 = tpu.matmul %139, %141, %cst_102 {dimension_numbers = #tpu.dot_dimension_numbers<[1], [0], [0], [1], [0, 0, 1, 1], [], []>} : vector<64x128xbf16>, vector<128x128xbf16>, vector<64x128xf32> -> vector<64x128xf32>
    %c11_103 = arith.constant 11 : index
    %c0_104 = arith.constant 0 : index
    %c0_105 = arith.constant 0 : index
    %143 = vector.load %arg3[%c11_103, %c0_104, %c0_105] : memref<12x1x128xf32, #tpu.memory_space<vmem>>, vector<1x1x128xf32>
    %144 = vector.shape_cast %143 : vector<1x1x128xf32> to vector<1x128xf32>
    %145 = vector.broadcast %144 : vector<1x128xf32> to vector<64x128xf32>
    %146 = arith.addf %142, %145 : vector<64x128xf32>
    %147 = arith.negf %146 : vector<64x128xf32>
    %148 = math.exp %147 : vector<64x128xf32>
    %cst_106 = arith.constant 1.000000e+00 : f32
    %149 = vector.broadcast %cst_106 : f32 to vector<64x128xf32>
    %150 = arith.addf %149, %148 : vector<64x128xf32>
    %151 = arith.divf %149, %150 : vector<64x128xf32>
    %c0_107 = arith.constant 0 : index
    %c0_108 = arith.constant 0 : index
    %152 = vector.load %arg4[%c0_107, %c0_108] : memref<64x128xf32, #tpu.memory_space<vmem>>, vector<64x128xf32>
    tpu.vector_store %arg4[%c0_107, %c0_108], %151 {strides = array<i32>} : memref<64x128xf32, #tpu.memory_space<vmem>>, vector<64x128xf32>,
    return
  }
}

</mosaic_0001>

<bundles_post_ra>
// kernel: forward.1
= control target key start
LH: loop header
LB: loop body
LE: loop exit
PB: predicated region body
PF: predicated region fallthrough
CT: control target
= control target key end

     0   :  { %9 = vsyncpa [#allocation4], 0  ;;  %s3755_s15 = smov [#allocation3]   ;;  %s3962_s0 = inlined_call_operand.vmem [shape: bf16[64,64], index: 0, kind: input, shape index: {}]   ;;  %s3963_s1 = inlined_call_operand.vmem [shape: bf16[64,16], index: 1, kind: input, shape index: {}]   ;;  %s3964_s2 = inlined_call_operand.hbm [shape: bf16[13,128,128], index: 2, kind: input, shape index: {}]   ;;  %s3965_s3 = inlined_call_operand.vmem [shape: f32[12,1,128], index: 3, kind: input, shape index: {}]   ;;  %s3966_s4 = inlined_call_operand.vmem [shape: f32[64,128], index: 4, kind: output, shape index: {}]  }
   0x1   :  { %s19_s16 = sshll.u32 %s3755_s15, 4  ;;  %s20_s16 = int_to_ptr.vmem [resolvable:$true] %s19_s16 }
   0x2   :  { %s3741_s17 = scalar_lea.vmem %s20_s16, 13312  ;;  %p3746_p1 = scmp.lt.s32.totalorder %s20_s16, %s20_s16 }
   0x3   :  { %p3742_p0 = scmp.ne.s32.totalorder %s20_s16, %s3741_s17  ;;  %p3747_p2 = scmp.lt.s32.totalorder %s3741_s17, %s3741_s17 }
   0x5   :  { %p3748_p3 = por %p3747_p2, %p3746_p1 }
   0x7   :  { %p3749_p4 = pnand %p3748_p3, %p3742_p0 }
   0x9   :  { %3752 = shalt.err (!%p3749_p4)
}
   0xa   :  { %s3756_s18 = smov 64   ;;  %s3757_s19 = smov 4  }
   0xb   :  { %25 = dma.hbm_to_vmem [thread:$0]  %s3964_s2, 13312, %s20_s16, [#allocation4], %s3756_s18, %s3756_s18, %s3757_s19  }
   0xc   :  { %3753 = dma.done.wait [#allocation4], 13312  }
   0xd   :  { %3754 = vsyncadd [#allocation4], 4294953984  ;;  %v3588_v0 = vld [vmem:[#allocation3] sm:$0xff]   ;;  %vm76_vm0 = vcmask 130048   ;;  %v3590_v2 = vld [vmem:[%s3963_s1 + $0x8] sm:$0xff]   ;;  %vm185_vm1 = vcmask 523264  }
   0xe   :  { %v3589_v1 = vld [vmem:[%s3963_s1] sm:$0xff]   ;;  %3159 = vmatprep.subr.bf16.mxu0 %v3588_v0  ;;  %v3591_v3 = vld [vmem:[%s3963_s1 + $0x10] sm:$0xff]   ;;  %v3592_v4 = vld [vmem:[%s3963_s1 + $0x18] sm:$0xff]  }
   0xf   :  { %3160 = vmatpush3.bf16.msra.mxu0 %v3588_v0  ;;  %3161 = vmatprep.mubr.msk.bf16.mxu0 %vm76_vm0, %v3589_v1  ;;  %v3801_v5 = vld [vmem:[%s3962_s0] sm:$0xff]   ;;  %v3597_v18 = vld [vmem:[#allocation3 + $0x78] sm:$0xff]   ;;  %v3810_v19 = vld [vmem:[%s3962_s0 + $0x8] sm:$0xff]  }
  0x10   :  { %3217 = vmatprep.mubr.msk.bf16.mxu1 %vm185_vm1, %v3801_v5  ;;  %v3815_v20 = vld [vmem:[%s3962_s0 + $0x10] sm:$0xff]   ;;  %v3599_v22 = vld [vmem:[#allocation3 + $0x68] sm:$0xff]   ;;  %v3824_v23 = vld [vmem:[%s3962_s0 + $0x18] sm:$0xff]  }
  0x11   :  { %v3598_v21 = vld [vmem:[#allocation3 + $0x70] sm:$0xff]   ;;  %v3600_v24 = vld [vmem:[#allocation3 + $0x60] sm:$0xff]   ;;  %v3601_v25 = vld [vmem:[#allocation3 + $0x58] sm:$0xff]  }
  0x12   :  { %3162 = vmatmul.mubr.msk.bf16.vlgmr.msra.gmra.mxu0 %vm76_vm0, %v3590_v2  ;;  %v3602_v26 = vld [vmem:[#allocation3 + $0x50] sm:$0xff]   ;;  %v3603_v27 = vld [vmem:[#allocation3 + $0x48] sm:$0xff]   ;;  %v3604_v28 = vld [vmem:[#allocation3 + $0x40] sm:$0xff]  }
  0x13   :  { %3165 = vmatprep.mubr.msk.bf16.mxu0 %vm76_vm0, %v3591_v3  ;;  %v2701_v31 = vld [vmem:[%s3965_s3] ss:$0 sm:$0xff] }
  0x1a   :  { %3166 = vmatmul.mubr.msk.bf16.gmra.mxu0 %vm76_vm0, %v3592_v4 }
  0x1b   :  { %3177 = vmatprep.mubr.msk.bf16.mxu0 %vm185_vm1, %v3801_v5 }
  0xd2   :  { %v3163_v6 = vpop.f32.mrf.mxu0 }
  0xd4   :  { %v123_v7 = vpop.f32.mrf.mxu0 }
  0xd6   :  { %v3164_v8 = vpop.f32.mrf.mxu0 }
  0xd7   :  { %v155_v16 = vpack.c.bf16 %v3164_v8, %v3163_v6  ;;  %v3606_v8 = vld [vmem:[#allocation3 + $0xb0] sm:$0xff]  }
  0xd8   :  { %v126_v9 = vpop.f32.mrf.mxu0 }
  0xd9   :  { %v154_v17 = vpack.c.bf16 %v126_v9, %v123_v7  ;;  %v3605_v7 = vld [vmem:[#allocation3 + $0xb8] sm:$0xff]   ;;  %v3607_v9 = vld [vmem:[#allocation3 + $0xa8] sm:$0xff]  }
  0xda   :  { %v3167_v10 = vpop.f32.mrf.mxu0 }
  0xdc   :  { %v139_v11 = vpop.f32.mrf.mxu0 }
  0xde   :  { %v3168_v12 = vpop.f32.mrf.mxu0 }
  0xdf   :  { %v157_v13 = vpack.c.bf16 %v3168_v12, %v3167_v10  ;;  %v3608_v10 = vld [vmem:[#allocation3 + $0xa0] sm:$0xff]   ;;  %v3610_v12 = vld [vmem:[#allocation3 + $0x90] sm:$0xff]  }
  0xe0   :  { %v142_v14 = vpop.f32.mrf.mxu0 }
  0xe1   :  { %v156_v15 = vpack.c.bf16 %v142_v14, %v139_v11  ;;  %3169 = vmatprep.subr.bf16.mxu0 %v157_v13  ;;  %v3609_v11 = vld [vmem:[#allocation3 + $0x98] sm:$0xff]   ;;  %v3612_v14 = vld [vmem:[#allocation3 + $0x80] sm:$0xff]  }
  0xe2   :  { %3170 = vmatpush3.bf16.msra.mxu0 %v157_v13  ;;  %v3611_v13 = vld [vmem:[#allocation3 + $0x88] sm:$0xff]  }
  0xe3   :  { %3171 = vmatprep.subr.bf16.mxu0 %v156_v15 }
  0xe6   :  { %3172 = vmatpush3.bf16.msra.mxu0 %v156_v15  ;;  %v3613_v15 = vld [vmem:[#allocation3 + $0xf8] sm:$0xff]  }
  0xe7   :  { %3173 = vmatprep.subr.bf16.mxu0 %v155_v16 }
  0xea   :  { %3174 = vmatpush3.bf16.msra.mxu0 %v155_v16  ;;  %v3614_v16 = vld [vmem:[#allocation3 + $0xf0] sm:$0xff]  }
  0xeb   :  { %3175 = vmatprep.subr.bf16.mxu0 %v154_v17 }
  0xee   :  { %3176 = vmatpush3.bf16.msra.mxu0 %v154_v17  ;;  %v3615_v17 = vld [vmem:[#allocation3 + $0xe8] sm:$0xff]  }
  0xef   :  { %3185 = vmatprep.subr.bf16.mxu0 %v3597_v18 }
  0xf1   :  { %3178 = vmatmul.mubr.msk.bf16.vlgmr.msra.gmra.mxu0 %vm185_vm1, %v3810_v19 }
  0xf2   :  { %3181 = vmatprep.mubr.msk.bf16.mxu0 %vm185_vm1, %v3815_v20  ;;  %3186 = vmatpush3.bf16.msra.mxu0 %v3597_v18  ;;  %v3616_v18 = vld [vmem:[#allocation3 + $0xe0] sm:$0xff]  }
  0xf3   :  { %3187 = vmatprep.subr.bf16.mxu0 %v3598_v21 }
  0xf6   :  { %3188 = vmatpush3.bf16.msra.mxu0 %v3598_v21  ;;  %v3617_v21 = vld [vmem:[#allocation3 + $0xd8] sm:$0xff]  }
  0xf7   :  { %3189 = vmatprep.subr.bf16.mxu0 %v3599_v22 }
  0xf9   :  { %3182 = vmatmul.mubr.msk.bf16.gmra.mxu0 %vm185_vm1, %v3824_v23 }
  0xfa   :  { %3190 = vmatpush3.bf16.msra.mxu0 %v3599_v22 }
  0xfb   :  { %3191 = vmatprep.subr.bf16.mxu0 %v3600_v24 }
  0xfe   :  { %3192 = vmatpush3.bf16.msra.mxu0 %v3600_v24  ;;  %v2719_v24 = vld [vmem:[%s3965_s3 + $0x1] ss:$0 sm:$0xff] }
  0xff   :  { %3193 = vmatprep.subr.bf16.mxu0 %v3601_v25 }
 0x102   :  { %3194 = vmatpush3.bf16.msra.mxu0 %v3601_v25 }
 0x103   :  { %3195 = vmatprep.subr.bf16.mxu0 %v3602_v26 }
 0x106   :  { %3196 = vmatpush3.bf16.msra.mxu0 %v3602_v26 }
 0x107   :  { %3197 = vmatprep.subr.bf16.mxu0 %v3603_v27 }
 0x10a   :  { %3198 = vmatpush3.bf16.msra.mxu0 %v3603_v27 }
 0x10b   :  { %3199 = vmatprep.subr.bf16.mxu0 %v3604_v28 }
 0x10e   :  { %3200 = vmatpush3.bf16.msra.mxu0 %v3604_v28 }
 0x10f   :  { %3249 = vmatprep.subr.bf16.mxu0 %v3613_v15 }
 0x1b1   :  { %v3179_v29 = vpop.f32.mrf.mxu0 }
 0x1b2   :  { %v241_v35 = vadd.f32 %v3179_v29, %v2701_v31 }
 0x1b3   :  { %v232_v30 = vpop.f32.mrf.mxu0 }
 0x1b4   :  { %v233_v33 = vadd.f32 %v2701_v31, %v232_v30  ;;  %v265_v42 = vmax.f32 %v241_v35, 0.0 }
 0x1b5   :  { %v3180_v32 = vpop.f32.mrf.mxu0 }
 0x1b6   :  { %v244_v34 = vadd.f32 %v3180_v32, %v2701_v31  ;;  %v263_v40 = vmax.f32 %v233_v33, 0.0 }
 0x1b7   :  { %v235_v36 = vpop.f32.mrf.mxu0 }
 0x1b8   :  { %v236_v37 = vadd.f32 %v2701_v31, %v235_v36  ;;  %v266_v38 = vmax.f32 %v244_v34, 0.0 }
 0x1b9   :  { %v3183_v39 = vpop.f32.mrf.mxu0 }
 0x1ba   :  { %v264_v41 = vmax.f32 %v236_v37, 0.0  ;;  %v272_v45 = vpack.c.bf16 %v266_v38, %v265_v42  ;;  %v257_v49 = vadd.f32 %v3183_v39, %v2701_v31 }
 0x1bb   :  { %v248_v43 = vpop.f32.mrf.mxu0 }
 0x1bc   :  { %v271_v44 = vpack.c.bf16 %v264_v41, %v263_v40  ;;  %v249_v47 = vadd.f32 %v2701_v31, %v248_v43  ;;  %v269_v55 = vmax.f32 %v257_v49, 0.0 }
 0x1bd   :  { %v3184_v46 = vpop.f32.mrf.mxu0 }
 0x1be   :  { %v260_v48 = vadd.f32 %v3184_v46, %v2701_v31  ;;  %3201 = vmatprep.mubr.bf16.mxu0 %v271_v44  ;;  %v267_v53 = vmax.f32 %v249_v47, 0.0 }
 0x1bf   :  { %v251_v50 = vpop.f32.mrf.mxu0  ;;  %3202 = vmatmul.mubr.bf16.vlgmr.msra.gmra.mxu0 %v272_v45 }
 0x1c0   :  { %v252_v51 = vadd.f32 %v2701_v31, %v251_v50  ;;  %v270_v52 = vmax.f32 %v260_v48, 0.0  ;;  %3250 = vmatpush3.bf16.msra.mxu0 %v3613_v15 }
 0x1c1   :  { %3251 = vmatprep.subr.bf16.mxu0 %v3614_v16 }
 0x1c2   :  { %v268_v54 = vmax.f32 %v252_v51, 0.0  ;;  %v274_v57 = vpack.c.bf16 %v270_v52, %v269_v55  ;;  %v3618_v52 = vld [vmem:[#allocation3 + $0xd0] sm:$0xff]  }
 0x1c4   :  { %v273_v56 = vpack.c.bf16 %v268_v54, %v267_v53  ;;  %3252 = vmatpush3.bf16.msra.mxu0 %v3614_v16  ;;  %v3619_v53 = vld [vmem:[#allocation3 + $0xc8] sm:$0xff]   ;;  %v3620_v54 = vld [vmem:[#allocation3 + $0xc0] sm:$0xff]  }
 0x1c5   :  { %3253 = vmatprep.subr.bf16.mxu0 %v3615_v17 }
 0x1c6   :  { %3205 = vmatprep.mubr.bf16.mxu0 %v273_v56 }
 0x1c7   :  { %3206 = vmatmul.mubr.bf16.gmra.mxu0 %v274_v57  ;;  %v2733_v57 = vld [vmem:[%s3965_s3 + $0x2] ss:$0 sm:$0xff] }
 0x1c8   :  { %3254 = vmatpush3.bf16.msra.mxu0 %v3615_v17 }
 0x1c9   :  { %3255 = vmatprep.subr.bf16.mxu0 %v3616_v18 }
 0x1cc   :  { %3256 = vmatpush3.bf16.msra.mxu0 %v3616_v18 }
 0x1cd   :  { %3257 = vmatprep.subr.bf16.mxu0 %v3617_v21 }
 0x1d0   :  { %3258 = vmatpush3.bf16.msra.mxu0 %v3617_v21 }
 0x1d1   :  { %3259 = vmatprep.subr.bf16.mxu0 %v3618_v52 }
 0x1d4   :  { %3260 = vmatpush3.bf16.msra.mxu0 %v3618_v52 }
 0x1d5   :  { %3261 = vmatprep.subr.bf16.mxu0 %v3619_v53 }
 0x1d8   :  { %3262 = vmatpush3.bf16.msra.mxu0 %v3619_v53 }
 0x1d9   :  { %3263 = vmatprep.subr.bf16.mxu0 %v3620_v54 }
 0x1dc   :  { %3264 = vmatpush3.bf16.msra.mxu0 %v3620_v54 }
 0x27f   :  { %v3203_v58 = vpop.f32.mrf.mxu0 }
 0x281   :  { %v374_v59 = vpop.f32.mrf.mxu0 }
 0x283   :  { %v3204_v60 = vpop.f32.mrf.mxu0 }
 0x284   :  { %v406_v4 = vpack.c.bf16 %v3204_v60, %v3203_v58 }
 0x285   :  { %v377_v61 = vpop.f32.mrf.mxu0 }
 0x286   :  { %v405_v6 = vpack.c.bf16 %v377_v61, %v374_v59 }
 0x287   :  { %v3207_v62 = vpop.f32.mrf.mxu0 }
 0x289   :  { %v390_v63 = vpop.f32.mrf.mxu0 }
 0x28b   :  { %v3208_v0 = vpop.f32.mrf.mxu0 }
 0x28c   :  { %v408_v1 = vpack.c.bf16 %v3208_v0, %v3207_v62 }
 0x28d   :  { %v393_v2 = vpop.f32.mrf.mxu0 }
 0x28e   :  { %v407_v3 = vpack.c.bf16 %v393_v2, %v390_v63  ;;  %3209 = vmatprep.subr.bf16.mxu1 %v408_v1 }
 0x28f   :  { %3210 = vmatpush3.bf16.msra.mxu1 %v408_v1 }
 0x290   :  { %3211 = vmatprep.subr.bf16.mxu1 %v407_v3 }
 0x293   :  { %3212 = vmatpush3.bf16.msra.mxu1 %v407_v3 }
 0x294   :  { %3213 = vmatprep.subr.bf16.mxu1 %v406_v4 }
 0x297   :  { %3214 = vmatpush3.bf16.msra.mxu1 %v406_v4 }
 0x298   :  { %3215 = vmatprep.subr.bf16.mxu1 %v405_v6 }
 0x29b   :  { %3216 = vmatpush3.bf16.msra.mxu1 %v405_v6 }
 0x29c   :  { %3225 = vmatprep.subr.bf16.mxu1 %v3605_v7 }
 0x29e   :  { %3218 = vmatmul.mubr.msk.bf16.vlgmr.msra.gmra.mxu1 %vm185_vm1, %v3810_v19 }
 0x29f   :  { %3221 = vmatprep.mubr.msk.bf16.mxu1 %vm185_vm1, %v3815_v20  ;;  %3226 = vmatpush3.bf16.msra.mxu1 %v3605_v7 }
 0x2a0   :  { %3227 = vmatprep.subr.bf16.mxu1 %v3606_v8 }
 0x2a3   :  { %3228 = vmatpush3.bf16.msra.mxu1 %v3606_v8 }
 0x2a4   :  { %3229 = vmatprep.subr.bf16.mxu1 %v3607_v9 }
 0x2a6   :  { %3222 = vmatmul.mubr.msk.bf16.gmra.mxu1 %vm185_vm1, %v3824_v23 }
 0x2a7   :  { %3230 = vmatpush3.bf16.msra.mxu1 %v3607_v9 }
 0x2a8   :  { %3231 = vmatprep.subr.bf16.mxu1 %v3608_v10 }
 0x2ab   :  { %3232 = vmatpush3.bf16.msra.mxu1 %v3608_v10 }
 0x2ac   :  { %3233 = vmatprep.subr.bf16.mxu1 %v3609_v11 }
 0x2af   :  { %3234 = vmatpush3.bf16.msra.mxu1 %v3609_v11 }
 0x2b0   :  { %3235 = vmatprep.subr.bf16.mxu1 %v3610_v12 }
 0x2b3   :  { %3236 = vmatpush3.bf16.msra.mxu1 %v3610_v12 }
 0x2b4   :  { %3237 = vmatprep.subr.bf16.mxu1 %v3611_v13 }
 0x2b7   :  { %3238 = vmatpush3.bf16.msra.mxu1 %v3611_v13 }
 0x2b8   :  { %3239 = vmatprep.subr.bf16.mxu1 %v3612_v14 }
 0x2bb   :  { %3240 = vmatpush3.bf16.msra.mxu1 %v3612_v14 }
 0x35e   :  { %v3219_v22 = vpop.f32.mrf.mxu1 }
 0x35f   :  { %v460_v26 = vadd.f32 %v3219_v22, %v2719_v24 }
 0x360   :  { %v451_v25 = vpop.f32.mrf.mxu1 }
 0x361   :  { %v452_v28 = vadd.f32 %v2719_v24, %v451_v25  ;;  %v484_v31 = vmax.f32 %v460_v26, 0.0  ;;  %v3622_v25 = vld [vmem:[#allocation3 + $0x130] sm:$0xff]   ;;  %v3623_v26 = vld [vmem:[#allocation3 + $0x128] sm:$0xff]  }
 0x362   :  { %v3220_v27 = vpop.f32.mrf.mxu1 }
 0x363   :  { %v463_v29 = vadd.f32 %v3220_v27, %v2719_v24  ;;  %v482_v35 = vmax.f32 %v452_v28, 0.0  ;;  %v3624_v27 = vld [vmem:[#allocation3 + $0x120] sm:$0xff]   ;;  %v3625_v28 = vld [vmem:[#allocation3 + $0x118] sm:$0xff]  }
 0x364   :  { %v454_v30 = vpop.f32.mrf.mxu1 }
 0x365   :  { %v485_v32 = vmax.f32 %v463_v29, 0.0  ;;  %v455_v33 = vadd.f32 %v2719_v24, %v454_v30 }
 0x366   :  { %v3223_v34 = vpop.f32.mrf.mxu1 }
 0x367   :  { %v491_v36 = vpack.c.bf16 %v485_v32, %v484_v31  ;;  %v483_v37 = vmax.f32 %v455_v33, 0.0  ;;  %v476_v40 = vadd.f32 %v3223_v34, %v2719_v24 }
 0x368   :  { %v467_v38 = vpop.f32.mrf.mxu1 }
 0x369   :  { %v490_v39 = vpack.c.bf16 %v483_v37, %v482_v35  ;;  %v468_v42 = vadd.f32 %v2719_v24, %v467_v38  ;;  %v488_v45 = vmax.f32 %v476_v40, 0.0 }
 0x36a   :  { %v3224_v41 = vpop.f32.mrf.mxu1 }
 0x36b   :  { %v479_v43 = vadd.f32 %v3224_v41, %v2719_v24  ;;  %3241 = vmatprep.mubr.bf16.mxu1 %v490_v39  ;;  %v486_v48 = vmax.f32 %v468_v42, 0.0  ;;  %v3626_v41 = vld [vmem:[#allocation3 + $0x110] sm:$0xff]   ;;  %v3627_v42 = vld [vmem:[#allocation3 + $0x108] sm:$0xff]  }
 0x36c   :  { %v470_v44 = vpop.f32.mrf.mxu1  ;;  %3242 = vmatmul.mubr.bf16.vlgmr.msra.gmra.mxu1 %v491_v36 }
 0x36d   :  { %v489_v46 = vmax.f32 %v479_v43, 0.0  ;;  %v471_v47 = vadd.f32 %v2719_v24, %v470_v44  ;;  %v3621_v24 = vld [vmem:[#allocation3 + $0x138] sm:$0xff]   ;;  %v3628_v43 = vld [vmem:[#allocation3 + $0x100] sm:$0xff]  }
 0x36e   :  { %3289 = vmatprep.subr.bf16.mxu0 %v3621_v24 }
 0x36f   :  { %v493_v49 = vpack.c.bf16 %v489_v46, %v488_v45  ;;  %v487_v50 = vmax.f32 %v471_v47, 0.0  ;;  %v2751_v46 = vld [vmem:[%s3965_s3 + $0x3] ss:$0 sm:$0xff] }
 0x371   :  { %v492_v51 = vpack.c.bf16 %v487_v50, %v486_v48 }
 0x373   :  { %3245 = vmatprep.mubr.bf16.mxu1 %v492_v51 }
 0x374   :  { %3246 = vmatmul.mubr.bf16.gmra.mxu1 %v493_v49 }
 0x375   :  { %3281 = vmatprep.mubr.msk.bf16.mxu1 %vm185_vm1, %v3801_v5 }
 0x42c   :  { %v3243_v55 = vpop.f32.mrf.mxu1 }
 0x42d   :  { %v646_v61 = vadd.f32 %v3243_v55, %v2733_v57 }
 0x42e   :  { %v637_v56 = vpop.f32.mrf.mxu1 }
 0x42f   :  { %v638_v59 = vadd.f32 %v2733_v57, %v637_v56  ;;  %v670_v4 = vmax.f32 %v646_v61, 0.0 }
 0x430   :  { %v3244_v58 = vpop.f32.mrf.mxu1 }
 0x431   :  { %v649_v60 = vadd.f32 %v3244_v58, %v2733_v57  ;;  %v668_v2 = vmax.f32 %v638_v59, 0.0 }
 0x432   :  { %v640_v62 = vpop.f32.mrf.mxu1 }
 0x433   :  { %v641_v63 = vadd.f32 %v2733_v57, %v640_v62  ;;  %v671_v0 = vmax.f32 %v649_v60, 0.0 }
 0x434   :  { %v3247_v1 = vpop.f32.mrf.mxu1 }
 0x435   :  { %v669_v3 = vmax.f32 %v641_v63, 0.0  ;;  %v677_v8 = vpack.c.bf16 %v671_v0, %v670_v4  ;;  %v662_v12 = vadd.f32 %v3247_v1, %v2733_v57 }
 0x436   :  { %v653_v6 = vpop.f32.mrf.mxu1 }
 0x437   :  { %v676_v7 = vpack.c.bf16 %v669_v3, %v668_v2  ;;  %v654_v10 = vadd.f32 %v2733_v57, %v653_v6  ;;  %v674_v18 = vmax.f32 %v662_v12, 0.0 }
 0x438   :  { %v3248_v9 = vpop.f32.mrf.mxu1 }
 0x439   :  { %v665_v11 = vadd.f32 %v3248_v9, %v2733_v57  ;;  %3265 = vmatprep.mubr.bf16.mxu0 %v676_v7  ;;  %v672_v16 = vmax.f32 %v654_v10, 0.0 }
 0x43a   :  { %v656_v13 = vpop.f32.mrf.mxu1  ;;  %3266 = vmatmul.mubr.bf16.vlgmr.msra.gmra.mxu0 %v677_v8 }
 0x43b   :  { %v657_v14 = vadd.f32 %v2733_v57, %v656_v13  ;;  %v675_v15 = vmax.f32 %v665_v11, 0.0  ;;  %3290 = vmatpush3.bf16.msra.mxu0 %v3621_v24 }
 0x43c   :  { %3291 = vmatprep.subr.bf16.mxu0 %v3622_v25 }
 0x43d   :  { %v673_v17 = vmax.f32 %v657_v14, 0.0  ;;  %v679_v22 = vpack.c.bf16 %v675_v15, %v674_v18 }
 0x43f   :  { %v678_v21 = vpack.c.bf16 %v673_v17, %v672_v16  ;;  %3292 = vmatpush3.bf16.msra.mxu0 %v3622_v25  ;;  %v3629_v25 = vld [vmem:[#allocation3 + $0x178] sm:$0xff]  }
 0x440   :  { %3293 = vmatprep.subr.bf16.mxu0 %v3623_v26 }
 0x441   :  { %3269 = vmatprep.mubr.bf16.mxu0 %v678_v21 }
 0x442   :  { %3270 = vmatmul.mubr.bf16.gmra.mxu0 %v679_v22 }
 0x443   :  { %3294 = vmatpush3.bf16.msra.mxu0 %v3623_v26  ;;  %v3630_v26 = vld [vmem:[#allocation3 + $0x170] sm:$0xff]  }
 0x444   :  { %3295 = vmatprep.subr.bf16.mxu0 %v3624_v27 }
 0x447   :  { %3296 = vmatpush3.bf16.msra.mxu0 %v3624_v27  ;;  %v3631_v27 = vld [vmem:[#allocation3 + $0x168] sm:$0xff]  }
 0x448   :  { %3297 = vmatprep.subr.bf16.mxu0 %v3625_v28 }
 0x44b   :  { %3298 = vmatpush3.bf16.msra.mxu0 %v3625_v28  ;;  %v3632_v28 = vld [vmem:[#allocation3 + $0x160] sm:$0xff]  }
 0x44c   :  { %3299 = vmatprep.subr.bf16.mxu0 %v3626_v41 }
 0x44f   :  { %3300 = vmatpush3.bf16.msra.mxu0 %v3626_v41 }
 0x450   :  { %3301 = vmatprep.subr.bf16.mxu0 %v3627_v42 }
 0x453   :  { %3302 = vmatpush3.bf16.msra.mxu0 %v3627_v42 }
 0x454   :  { %3303 = vmatprep.subr.bf16.mxu0 %v3628_v43 }
 0x457   :  { %3304 = vmatpush3.bf16.msra.mxu0 %v3628_v43 }
 0x4fa   :  { %v3267_v29 = vpop.f32.mrf.mxu0 }
 0x4fc   :  { %v779_v30 = vpop.f32.mrf.mxu0 }
 0x4fe   :  { %v3268_v31 = vpop.f32.mrf.mxu0 }
 0x4ff   :  { %v811_v39 = vpack.c.bf16 %v3268_v31, %v3267_v29  ;;  %v3633_v29 = vld [vmem:[#allocation3 + $0x158] sm:$0xff]   ;;  %v3635_v31 = vld [vmem:[#allocation3 + $0x148] sm:$0xff]  }
 0x500   :  { %v782_v32 = vpop.f32.mrf.mxu0 }
 0x501   :  { %v810_v40 = vpack.c.bf16 %v782_v32, %v779_v30  ;;  %v3634_v30 = vld [vmem:[#allocation3 + $0x150] sm:$0xff]   ;;  %v3636_v32 = vld [vmem:[#allocation3 + $0x140] sm:$0xff]  }
 0x502   :  { %v3271_v33 = vpop.f32.mrf.mxu0 }
 0x504   :  { %v795_v34 = vpop.f32.mrf.mxu0 }
 0x506   :  { %v3272_v35 = vpop.f32.mrf.mxu0 }
 0x507   :  { %v813_v36 = vpack.c.bf16 %v3272_v35, %v3271_v33  ;;  %v3637_v33 = vld [vmem:[#allocation3 + $0x1b8] sm:$0xff]   ;;  %v3639_v35 = vld [vmem:[#allocation3 + $0x1a8] sm:$0xff]  }
 0x508   :  { %v798_v37 = vpop.f32.mrf.mxu0  ;;  %3353 = vmatprep.subr.bf16.mxu0 %v3637_v33 }
 0x509   :  { %v812_v38 = vpack.c.bf16 %v798_v37, %v795_v34  ;;  %3273 = vmatprep.subr.bf16.mxu1 %v813_v36  ;;  %v3638_v34 = vld [vmem:[#allocation3 + $0x1b0] sm:$0xff]   ;;  %v3641_v37 = vld [vmem:[#allocation3 + $0x198] sm:$0xff]  }
 0x50a   :  { %3274 = vmatpush3.bf16.msra.mxu1 %v813_v36  ;;  %v3640_v36 = vld [vmem:[#allocation3 + $0x1a0] sm:$0xff]  }
 0x50b   :  { %3275 = vmatprep.subr.bf16.mxu1 %v812_v38 }
 0x50e   :  { %3276 = vmatpush3.bf16.msra.mxu1 %v812_v38 }
 0x50f   :  { %3277 = vmatprep.subr.bf16.mxu1 %v811_v39 }
 0x512   :  { %3278 = vmatpush3.bf16.msra.mxu1 %v811_v39  ;;  %v2765_v39 = vld [vmem:[%s3965_s3 + $0x4] ss:$0 sm:$0xff] }
 0x513   :  { %3279 = vmatprep.subr.bf16.mxu1 %v810_v40 }
 0x516   :  { %3280 = vmatpush3.bf16.msra.mxu1 %v810_v40 }
 0x519   :  { %3282 = vmatmul.mubr.msk.bf16.vlgmr.msra.gmra.mxu1 %vm185_vm1, %v3810_v19 }
 0x51a   :  { %3285 = vmatprep.mubr.msk.bf16.mxu1 %vm185_vm1, %v3815_v20 }
 0x521   :  { %3286 = vmatmul.mubr.msk.bf16.gmra.mxu1 %vm185_vm1, %v3824_v23 }
 0x522   :  { %3321 = vmatprep.mubr.msk.bf16.mxu1 %vm185_vm1, %v3801_v5 }
 0x5d9   :  { %v3283_v44 = vpop.f32.mrf.mxu1 }
 0x5da   :  { %v865_v50 = vadd.f32 %v3283_v44, %v2751_v46 }
 0x5db   :  { %v856_v45 = vpop.f32.mrf.mxu1 }
 0x5dc   :  { %v857_v48 = vadd.f32 %v2751_v46, %v856_v45  ;;  %v889_v57 = vmax.f32 %v865_v50, 0.0 }
 0x5dd   :  { %v3284_v47 = vpop.f32.mrf.mxu1 }
 0x5de   :  { %v868_v49 = vadd.f32 %v3284_v47, %v2751_v46  ;;  %v887_v55 = vmax.f32 %v857_v48, 0.0 }
 0x5df   :  { %v859_v51 = vpop.f32.mrf.mxu1 }
 0x5e0   :  { %v860_v52 = vadd.f32 %v2751_v46, %v859_v51  ;;  %v890_v53 = vmax.f32 %v868_v49, 0.0 }
 0x5e1   :  { %v3287_v54 = vpop.f32.mrf.mxu1 }
 0x5e2   :  { %v888_v56 = vmax.f32 %v860_v52, 0.0  ;;  %v896_v60 = vpack.c.bf16 %v890_v53, %v889_v57  ;;  %v881_v0 = vadd.f32 %v3287_v54, %v2751_v46 }
 0x5e3   :  { %v872_v58 = vpop.f32.mrf.mxu1 }
 0x5e4   :  { %v895_v59 = vpack.c.bf16 %v888_v56, %v887_v55  ;;  %v873_v62 = vadd.f32 %v2751_v46, %v872_v58  ;;  %v893_v7 = vmax.f32 %v881_v0, 0.0 }
 0x5e5   :  { %v3288_v61 = vpop.f32.mrf.mxu1 }
 0x5e6   :  { %v884_v63 = vadd.f32 %v3288_v61, %v2751_v46  ;;  %3305 = vmatprep.mubr.bf16.mxu0 %v895_v59  ;;  %v891_v4 = vmax.f32 %v873_v62, 0.0 }
 0x5e7   :  { %v875_v1 = vpop.f32.mrf.mxu1  ;;  %3306 = vmatmul.mubr.bf16.vlgmr.msra.gmra.mxu0 %v896_v60 }
 0x5e8   :  { %v876_v2 = vadd.f32 %v2751_v46, %v875_v1  ;;  %v894_v3 = vmax.f32 %v884_v63, 0.0  ;;  %3354 = vmatpush3.bf16.msra.mxu0 %v3637_v33 }
 0x5e9   :  { %3355 = vmatprep.subr.bf16.mxu0 %v3638_v34 }
 0x5ea   :  { %v892_v6 = vmax.f32 %v876_v2, 0.0  ;;  %v898_v9 = vpack.c.bf16 %v894_v3, %v893_v7  ;;  %v3642_v3 = vld [vmem:[#allocation3 + $0x190] sm:$0xff]  }
 0x5ec   :  { %v897_v8 = vpack.c.bf16 %v892_v6, %v891_v4  ;;  %3356 = vmatpush3.bf16.msra.mxu0 %v3638_v34  ;;  %v3643_v4 = vld [vmem:[#allocation3 + $0x188] sm:$0xff]   ;;  %v3644_v6 = vld [vmem:[#allocation3 + $0x180] sm:$0xff]  }
 0x5ed   :  { %3357 = vmatprep.subr.bf16.mxu0 %v3639_v35 }
 0x5ee   :  { %3309 = vmatprep.mubr.bf16.mxu0 %v897_v8 }
 0x5ef   :  { %3310 = vmatmul.mubr.bf16.gmra.mxu0 %v898_v9  ;;  %v2779_v9 = vld [vmem:[%s3965_s3 + $0x5] ss:$0 sm:$0xff] }
 0x5f0   :  { %3358 = vmatpush3.bf16.msra.mxu0 %v3639_v35 }
 0x5f1   :  { %3359 = vmatprep.subr.bf16.mxu0 %v3640_v36 }
 0x5f4   :  { %3360 = vmatpush3.bf16.msra.mxu0 %v3640_v36 }
 0x5f5   :  { %3361 = vmatprep.subr.bf16.mxu0 %v3641_v37 }
 0x5f8   :  { %3362 = vmatpush3.bf16.msra.mxu0 %v3641_v37 }
 0x5f9   :  { %3363 = vmatprep.subr.bf16.mxu0 %v3642_v3 }
 0x5fc   :  { %3364 = vmatpush3.bf16.msra.mxu0 %v3642_v3 }
 0x5fd   :  { %3365 = vmatprep.subr.bf16.mxu0 %v3643_v4 }
 0x600   :  { %3366 = vmatpush3.bf16.msra.mxu0 %v3643_v4 }
 0x601   :  { %3367 = vmatprep.subr.bf16.mxu0 %v3644_v6 }
 0x604   :  { %3368 = vmatpush3.bf16.msra.mxu0 %v3644_v6 }
 0x6a7   :  { %v3307_v10 = vpop.f32.mrf.mxu0 }
 0x6a9   :  { %v998_v11 = vpop.f32.mrf.mxu0 }
 0x6ab   :  { %v3308_v12 = vpop.f32.mrf.mxu0 }
 0x6ac   :  { %v1030_v22 = vpack.c.bf16 %v3308_v12, %v3307_v10 }
 0x6ad   :  { %v1001_v13 = vpop.f32.mrf.mxu0 }
 0x6ae   :  { %v1029_v24 = vpack.c.bf16 %v1001_v13, %v998_v11 }
 0x6af   :  { %v3311_v14 = vpop.f32.mrf.mxu0 }
 0x6b1   :  { %v1014_v15 = vpop.f32.mrf.mxu0 }
 0x6b3   :  { %v3312_v16 = vpop.f32.mrf.mxu0 }
 0x6b4   :  { %v1032_v17 = vpack.c.bf16 %v3312_v16, %v3311_v14 }
 0x6b5   :  { %v1017_v18 = vpop.f32.mrf.mxu0 }
 0x6b6   :  { %v1031_v21 = vpack.c.bf16 %v1017_v18, %v1014_v15  ;;  %3313 = vmatprep.subr.bf16.mxu1 %v1032_v17 }
 0x6b7   :  { %3314 = vmatpush3.bf16.msra.mxu1 %v1032_v17 }
 0x6b8   :  { %3315 = vmatprep.subr.bf16.mxu1 %v1031_v21 }
 0x6bb   :  { %3316 = vmatpush3.bf16.msra.mxu1 %v1031_v21 }
 0x6bc   :  { %3317 = vmatprep.subr.bf16.mxu1 %v1030_v22 }
 0x6bf   :  { %3318 = vmatpush3.bf16.msra.mxu1 %v1030_v22 }
 0x6c0   :  { %3319 = vmatprep.subr.bf16.mxu1 %v1029_v24 }
 0x6c3   :  { %3320 = vmatpush3.bf16.msra.mxu1 %v1029_v24 }
 0x6c4   :  { %3329 = vmatprep.subr.bf16.mxu1 %v3629_v25 }
 0x6c6   :  { %3322 = vmatmul.mubr.msk.bf16.vlgmr.msra.gmra.mxu1 %vm185_vm1, %v3810_v19 }
 0x6c7   :  { %3325 = vmatprep.mubr.msk.bf16.mxu1 %vm185_vm1, %v3815_v20  ;;  %3330 = vmatpush3.bf16.msra.mxu1 %v3629_v25 }
 0x6c8   :  { %3331 = vmatprep.subr.bf16.mxu1 %v3630_v26 }
 0x6cb   :  { %3332 = vmatpush3.bf16.msra.mxu1 %v3630_v26 }
 0x6cc   :  { %3333 = vmatprep.subr.bf16.mxu1 %v3631_v27 }
 0x6ce   :  { %3326 = vmatmul.mubr.msk.bf16.gmra.mxu1 %vm185_vm1, %v3824_v23 }
 0x6cf   :  { %3334 = vmatpush3.bf16.msra.mxu1 %v3631_v27 }
 0x6d0   :  { %3335 = vmatprep.subr.bf16.mxu1 %v3632_v28 }
 0x6d3   :  { %3336 = vmatpush3.bf16.msra.mxu1 %v3632_v28 }
 0x6d4   :  { %3337 = vmatprep.subr.bf16.mxu1 %v3633_v29 }
 0x6d7   :  { %3338 = vmatpush3.bf16.msra.mxu1 %v3633_v29 }
 0x6d8   :  { %3339 = vmatprep.subr.bf16.mxu1 %v3634_v30 }
 0x6db   :  { %3340 = vmatpush3.bf16.msra.mxu1 %v3634_v30 }
 0x6dc   :  { %3341 = vmatprep.subr.bf16.mxu1 %v3635_v31 }
 0x6df   :  { %3342 = vmatpush3.bf16.msra.mxu1 %v3635_v31 }
 0x6e0   :  { %3343 = vmatprep.subr.bf16.mxu1 %v3636_v32 }
 0x6e3   :  { %3344 = vmatpush3.bf16.msra.mxu1 %v3636_v32 }
 0x786   :  { %v3323_v38 = vpop.f32.mrf.mxu1 }
 0x787   :  { %v1084_v41 = vadd.f32 %v3323_v38, %v2765_v39 }
 0x788   :  { %v1075_v40 = vpop.f32.mrf.mxu1 }
 0x789   :  { %v1076_v43 = vadd.f32 %v2765_v39, %v1075_v40  ;;  %v1108_v46 = vmax.f32 %v1084_v41, 0.0  ;;  %v3646_v40 = vld [vmem:[#allocation3 + $0x1f0] sm:$0xff]   ;;  %v3647_v41 = vld [vmem:[#allocation3 + $0x1e8] sm:$0xff]  }
 0x78a   :  { %v3324_v42 = vpop.f32.mrf.mxu1 }
 0x78b   :  { %v1087_v44 = vadd.f32 %v3324_v42, %v2765_v39  ;;  %v1106_v50 = vmax.f32 %v1076_v43, 0.0  ;;  %v3648_v42 = vld [vmem:[#allocation3 + $0x1e0] sm:$0xff]   ;;  %v3649_v43 = vld [vmem:[#allocation3 + $0x1d8] sm:$0xff]  }
 0x78c   :  { %v1078_v45 = vpop.f32.mrf.mxu1 }
 0x78d   :  { %v1109_v47 = vmax.f32 %v1087_v44, 0.0  ;;  %v1079_v48 = vadd.f32 %v2765_v39, %v1078_v45 }
 0x78e   :  { %v3327_v49 = vpop.f32.mrf.mxu1 }
 0x78f   :  { %v1115_v51 = vpack.c.bf16 %v1109_v47, %v1108_v46  ;;  %v1107_v52 = vmax.f32 %v1079_v48, 0.0  ;;  %v1100_v55 = vadd.f32 %v3327_v49, %v2765_v39 }
 0x790   :  { %v1091_v53 = vpop.f32.mrf.mxu1 }
 0x791   :  { %2943 = vst [vmem:[#allocation2 + $0x28] sm:$0xff] %v1115_v51   ;;  %v1114_v54 = vpack.c.bf16 %v1107_v52, %v1106_v50  ;;  %v1092_v57 = vadd.f32 %v2765_v39, %v1091_v53  ;;  %v1112_v60 = vmax.f32 %v1100_v55, 0.0 }
 0x792   :  { %v3328_v56 = vpop.f32.mrf.mxu1 }
 0x793   :  { %2924 = vst [vmem:[#allocation2 + $0x20] sm:$0xff] %v1114_v54   ;;  %v1103_v58 = vadd.f32 %v3328_v56, %v2765_v39  ;;  %3345 = vmatprep.mubr.bf16.mxu1 %v1114_v54  ;;  %v1110_v63 = vmax.f32 %v1092_v57, 0.0  ;;  %v3650_v56 = vld [vmem:[#allocation3 + $0x1d0] sm:$0xff]   ;;  %v3651_v57 = vld [vmem:[#allocation3 + $0x1c8] sm:$0xff]  }
 0x794   :  { %v1094_v59 = vpop.f32.mrf.mxu1  ;;  %3346 = vmatmul.mubr.bf16.vlgmr.msra.gmra.mxu1 %v1115_v51 }
 0x795   :  { %v1113_v61 = vmax.f32 %v1103_v58, 0.0  ;;  %v1095_v62 = vadd.f32 %v2765_v39, %v1094_v59  ;;  %v3645_v39 = vld [vmem:[#allocation3 + $0x1f8] sm:$0xff]   ;;  %v3652_v58 = vld [vmem:[#allocation3 + $0x1c0] sm:$0xff]  }
 0x796   :  { %3393 = vmatprep.subr.bf16.mxu0 %v3645_v39  ;;  %v3653_v59 = vld [vmem:[#allocation3 + $0x2b8] sm:$0xff]  }
 0x797   :  { %v1117_v0 = vpack.c.bf16 %v1113_v61, %v1112_v60  ;;  %v1111_v1 = vmax.f32 %v1095_v62, 0.0 }
 0x799   :  { %2945 = vst [vmem:[#allocation2 + $0x38] sm:$0xff] %v1117_v0   ;;  %v1116_v2 = vpack.c.bf16 %v1111_v1, %v1110_v63 }
 0x79b   :  { %2944 = vst [vmem:[#allocation2 + $0x30] sm:$0xff] %v1116_v2   ;;  %3349 = vmatprep.mubr.bf16.mxu1 %v1116_v2 }
 0x79c   :  { %3350 = vmatmul.mubr.bf16.gmra.mxu1 %v1117_v0 }
 0x79d   :  { %3385 = vmatprep.mubr.msk.bf16.mxu1 %vm185_vm1, %v3801_v5 }
 0x854   :  { %v3347_v7 = vpop.f32.mrf.mxu1 }
 0x855   :  { %v1271_v13 = vadd.f32 %v3347_v7, %v2779_v9 }
 0x856   :  { %v1262_v8 = vpop.f32.mrf.mxu1 }
 0x857   :  { %v1263_v11 = vadd.f32 %v2779_v9, %v1262_v8  ;;  %v1295_v22 = vmax.f32 %v1271_v13, 0.0 }
 0x858   :  { %v3348_v10 = vpop.f32.mrf.mxu1 }
 0x859   :  { %v1274_v12 = vadd.f32 %v3348_v10, %v2779_v9  ;;  %v1293_v18 = vmax.f32 %v1263_v11, 0.0  ;;  %v3654_v11 = vld [vmem:[#allocation3 + $0x2b0] sm:$0xff]  }
 0x85a   :  { %v1265_v14 = vpop.f32.mrf.mxu1 }
 0x85b   :  { %v1266_v15 = vadd.f32 %v2779_v9, %v1265_v14  ;;  %v1296_v16 = vmax.f32 %v1274_v12, 0.0 }
 0x85c   :  { %v3351_v17 = vpop.f32.mrf.mxu1 }
 0x85d   :  { %v1294_v21 = vmax.f32 %v1266_v15, 0.0  ;;  %v1302_v26 = vpack.c.bf16 %v1296_v16, %v1295_v22  ;;  %v1287_v30 = vadd.f32 %v3351_v17, %v2779_v9 }
 0x85e   :  { %v1278_v24 = vpop.f32.mrf.mxu1 }
 0x85f   :  { %v1301_v25 = vpack.c.bf16 %v1294_v21, %v1293_v18  ;;  %v1279_v28 = vadd.f32 %v2779_v9, %v1278_v24  ;;  %v1299_v36 = vmax.f32 %v1287_v30, 0.0  ;;  %v3655_v18 = vld [vmem:[#allocation3 + $0x2a8] sm:$0xff]   ;;  %v3659_v30 = vld [vmem:[#allocation3 + $0x290] sm:$0xff]  }
 0x860   :  { %v3352_v27 = vpop.f32.mrf.mxu1 }
 0x861   :  { %v1290_v29 = vadd.f32 %v3352_v27, %v2779_v9  ;;  %3369 = vmatprep.mubr.bf16.mxu0 %v1301_v25  ;;  %v1297_v34 = vmax.f32 %v1279_v28, 0.0  ;;  %v3657_v27 = vld [vmem:[#allocation3 + $0x2a0] sm:$0xff]  }
 0x862   :  { %v1281_v31 = vpop.f32.mrf.mxu1  ;;  %3370 = vmatmul.mubr.bf16.vlgmr.msra.gmra.mxu0 %v1302_v26  ;;  %v3656_v28 = vld [vmem:[#allocation2 + $0x20] sm:$0xff]  }
 0x863   :  { %v1282_v32 = vadd.f32 %v2779_v9, %v1281_v31  ;;  %v1300_v33 = vmax.f32 %v1290_v29, 0.0  ;;  %3394 = vmatpush3.bf16.msra.mxu0 %v3645_v39  ;;  %v3658_v29 = vld [vmem:[#allocation3 + $0x298] sm:$0xff]   ;;  %v3660_v31 = vld [vmem:[#allocation3 + $0x288] sm:$0xff]  }
 0x864   :  { %3395 = vmatprep.subr.bf16.mxu0 %v3646_v40 }
 0x865   :  { %v1298_v35 = vmax.f32 %v1282_v32, 0.0  ;;  %v1304_v38 = vpack.c.bf16 %v1300_v33, %v1299_v36  ;;  %v3661_v32 = vld [vmem:[#allocation3 + $0x280] sm:$0xff]   ;;  %v3662_v33 = vld [vmem:[#allocation2 + $0x28] sm:$0xff]  }
 0x866   :  { %v3884_v36 = vld [vmem:[%s3962_s0] sm:$0xff]  }
 0x867   :  { %v1303_v37 = vpack.c.bf16 %v1298_v35, %v1297_v34  ;;  %3396 = vmatpush3.bf16.msra.mxu0 %v3646_v40  ;;  %v3663_v34 = vld [vmem:[#allocation2 + $0x30] sm:$0xff]   ;;  %v3664_v35 = vld [vmem:[#allocation2 + $0x38] sm:$0xff]  }
 0x868   :  { %3397 = vmatprep.subr.bf16.mxu0 %v3647_v41 }
 0x869   :  { %3373 = vmatprep.mubr.bf16.mxu0 %v1303_v37 }
 0x86a   :  { %3374 = vmatmul.mubr.bf16.gmra.mxu0 %v1304_v38 }
 0x86b   :  { %3398 = vmatpush3.bf16.msra.mxu0 %v3647_v41 }
 0x86c   :  { %3399 = vmatprep.subr.bf16.mxu0 %v3648_v42 }
 0x86f   :  { %3400 = vmatpush3.bf16.msra.mxu0 %v3648_v42 }
 0x870   :  { %3401 = vmatprep.subr.bf16.mxu0 %v3649_v43 }
 0x873   :  { %3402 = vmatpush3.bf16.msra.mxu0 %v3649_v43 }
 0x874   :  { %3403 = vmatprep.subr.bf16.mxu0 %v3650_v56 }
 0x877   :  { %3404 = vmatpush3.bf16.msra.mxu0 %v3650_v56  ;;  %v3669_v56 = vld [vmem:[#allocation3 + $0x218] sm:$0xff]  }
 0x878   :  { %3405 = vmatprep.subr.bf16.mxu0 %v3651_v57 }
 0x87b   :  { %3406 = vmatpush3.bf16.msra.mxu0 %v3651_v57  ;;  %v3670_v57 = vld [vmem:[#allocation3 + $0x210] sm:$0xff]  }
 0x87c   :  { %3407 = vmatprep.subr.bf16.mxu0 %v3652_v58 }
 0x87f   :  { %3408 = vmatpush3.bf16.msra.mxu0 %v3652_v58  ;;  %v3671_v58 = vld [vmem:[#allocation3 + $0x208] sm:$0xff]  }
 0x880   :  { %3457 = vmatprep.subr.bf16.mxu0 %v3653_v59 }
 0x922   :  { %v3371_v44 = vpop.f32.mrf.mxu0 }
 0x924   :  { %v1404_v45 = vpop.f32.mrf.mxu0 }
 0x926   :  { %v3372_v46 = vpop.f32.mrf.mxu0 }
 0x927   :  { %v1436_v54 = vpack.c.bf16 %v3372_v46, %v3371_v44 }
 0x928   :  { %v1407_v47 = vpop.f32.mrf.mxu0 }
 0x929   :  { %v1435_v55 = vpack.c.bf16 %v1407_v47, %v1404_v45 }
 0x92a   :  { %v3375_v48 = vpop.f32.mrf.mxu0 }
 0x92c   :  { %v1420_v49 = vpop.f32.mrf.mxu0 }
 0x92e   :  { %v3376_v50 = vpop.f32.mrf.mxu0 }
 0x92f   :  { %v1438_v51 = vpack.c.bf16 %v3376_v50, %v3375_v48  ;;  %v3666_v50 = vld [vmem:[#allocation3 + $0x230] sm:$0xff]  }
 0x930   :  { %v1423_v52 = vpop.f32.mrf.mxu0 }
 0x931   :  { %v1437_v53 = vpack.c.bf16 %v1423_v52, %v1420_v49  ;;  %3377 = vmatprep.subr.bf16.mxu1 %v1438_v51  ;;  %v3665_v49 = vld [vmem:[#allocation3 + $0x238] sm:$0xff]   ;;  %v3898_v52 = vld [vmem:[%s3962_s0 + $0x10] sm:$0xff]  }
 0x932   :  { %3378 = vmatpush3.bf16.msra.mxu1 %v1438_v51  ;;  %v3891_v51 = vld [vmem:[%s3962_s0 + $0x8] sm:$0xff]  }
 0x933   :  { %3379 = vmatprep.subr.bf16.mxu1 %v1437_v53 }
 0x936   :  { %3380 = vmatpush3.bf16.msra.mxu1 %v1437_v53  ;;  %v3667_v53 = vld [vmem:[#allocation3 + $0x228] sm:$0xff]  }
 0x937   :  { %3381 = vmatprep.subr.bf16.mxu1 %v1436_v54 }
 0x93a   :  { %3382 = vmatpush3.bf16.msra.mxu1 %v1436_v54  ;;  %v3668_v54 = vld [vmem:[#allocation3 + $0x220] sm:$0xff]  }
 0x93b   :  { %3383 = vmatprep.subr.bf16.mxu1 %v1435_v55 }
 0x93e   :  { %3384 = vmatpush3.bf16.msra.mxu1 %v1435_v55  ;;  %v3905_v55 = vld [vmem:[%s3962_s0 + $0x18] sm:$0xff]  }
 0x941   :  { %3386 = vmatmul.mubr.msk.bf16.vlgmr.msra.gmra.mxu1 %vm185_vm1, %v3810_v19 }
 0x942   :  { %3389 = vmatprep.mubr.msk.bf16.mxu1 %vm185_vm1, %v3815_v20  ;;  %v2797_v20 = vld [vmem:[%s3965_s3 + $0x6] ss:$0 sm:$0xff] }
 0x949   :  { %3390 = vmatmul.mubr.msk.bf16.gmra.mxu1 %vm185_vm1, %v3824_v23 }
 0x94a   :  { %3425 = vmatprep.mubr.msk.bf16.mxu1 %vm185_vm1, %v3801_v5 }
 0xa01   :  { %v3387_v19 = vpop.f32.mrf.mxu1 }
 0xa02   :  { %v1490_v62 = vadd.f32 %v3387_v19, %v2797_v20  ;;  %v3673_v19 = vld [vmem:[#allocation3 + $0x278] sm:$0xff]  }
 0xa03   :  { %v1481_v60 = vpop.f32.mrf.mxu1 }
 0xa04   :  { %v1482_v61 = vadd.f32 %v2797_v20, %v1481_v60  ;;  %v1514_v6 = vmax.f32 %v1490_v62, 0.0 }
 0xa05   :  { %v3388_v23 = vpop.f32.mrf.mxu1 }
 0xa06   :  { %v1493_v5 = vadd.f32 %v3388_v23, %v2797_v20  ;;  %v1512_v3 = vmax.f32 %v1482_v61, 0.0  ;;  %v2811_v23 = vld [vmem:[%s3965_s3 + $0x7] ss:$0 sm:$0xff] }
 0xa07   :  { %v1484_v63 = vpop.f32.mrf.mxu1 }
 0xa08   :  { %v1485_v0 = vadd.f32 %v2797_v20, %v1484_v63  ;;  %v1515_v1 = vmax.f32 %v1493_v5, 0.0 }
 0xa09   :  { %v3391_v2 = vpop.f32.mrf.mxu1 }
 0xa0a   :  { %v1513_v4 = vmax.f32 %v1485_v0, 0.0  ;;  %v1521_v9 = vpack.c.bf16 %v1515_v1, %v1514_v6  ;;  %v1506_v14 = vadd.f32 %v3391_v2, %v2797_v20 }
 0xa0b   :  { %v1497_v7 = vpop.f32.mrf.mxu1 }
 0xa0c   :  { %v1520_v8 = vpack.c.bf16 %v1513_v4, %v1512_v3  ;;  %v1498_v12 = vadd.f32 %v2797_v20, %v1497_v7  ;;  %v1518_v24 = vmax.f32 %v1506_v14, 0.0 }
 0xa0d   :  { %v3392_v10 = vpop.f32.mrf.mxu1 }
 0xa0e   :  { %v1509_v13 = vadd.f32 %v3392_v10, %v2797_v20  ;;  %3409 = vmatprep.mubr.bf16.mxu0 %v1520_v8  ;;  %v1516_v21 = vmax.f32 %v1498_v12, 0.0  ;;  %v3674_v12 = vld [vmem:[#allocation3 + $0x270] sm:$0xff]  }
 0xa0f   :  { %v1500_v15 = vpop.f32.mrf.mxu1  ;;  %3410 = vmatmul.mubr.bf16.vlgmr.msra.gmra.mxu0 %v1521_v9 }
 0xa10   :  { %v1501_v16 = vadd.f32 %v2797_v20, %v1500_v15  ;;  %3458 = vmatpush3.bf16.msra.mxu0 %v3653_v59  ;;  %v1519_v17 = vmax.f32 %v1509_v13, 0.0  ;;  %v3672_v59 = vld [vmem:[#allocation3 + $0x200] sm:$0xff]  }
 0xa11   :  { %3459 = vmatprep.subr.bf16.mxu0 %v3654_v11 }
 0xa12   :  { %v1517_v22 = vmax.f32 %v1501_v16, 0.0  ;;  %v1523_v26 = vpack.c.bf16 %v1519_v17, %v1518_v24 }
 0xa14   :  { %v1522_v25 = vpack.c.bf16 %v1517_v22, %v1516_v21  ;;  %3460 = vmatpush3.bf16.msra.mxu0 %v3654_v11  ;;  %v3675_v21 = vld [vmem:[#allocation3 + $0x268] sm:$0xff]  }
 0xa15   :  { %3461 = vmatprep.subr.bf16.mxu0 %v3655_v18 }
 0xa16   :  { %3413 = vmatprep.mubr.bf16.mxu0 %v1522_v25 }
 0xa17   :  { %3414 = vmatmul.mubr.bf16.gmra.mxu0 %v1523_v26 }
 0xa18   :  { %3462 = vmatpush3.bf16.msra.mxu0 %v3655_v18  ;;  %3473 = vmatprep.mubr.bf16.mxu0 %v3656_v28  ;;  %v3676_v28 = vld [vmem:[#allocation3 + $0x260] sm:$0xff]  }
 0xa19   :  { %3463 = vmatprep.subr.bf16.mxu0 %v3657_v27 }
 0xa1c   :  { %3464 = vmatpush3.bf16.msra.mxu0 %v3657_v27 }
 0xa1d   :  { %3465 = vmatprep.subr.bf16.mxu0 %v3658_v29 }
 0xa20   :  { %3466 = vmatpush3.bf16.msra.mxu0 %v3658_v29  ;;  %v3677_v29 = vld [vmem:[#allocation3 + $0x258] sm:$0xff]  }
 0xa21   :  { %3467 = vmatprep.subr.bf16.mxu0 %v3659_v30 }
 0xa24   :  { %3468 = vmatpush3.bf16.msra.mxu0 %v3659_v30  ;;  %v3678_v30 = vld [vmem:[#allocation3 + $0x250] sm:$0xff]  }
 0xa25   :  { %3469 = vmatprep.subr.bf16.mxu0 %v3660_v31 }
 0xa28   :  { %3470 = vmatpush3.bf16.msra.mxu0 %v3660_v31  ;;  %v3679_v31 = vld [vmem:[#allocation3 + $0x248] sm:$0xff]  }
 0xa29   :  { %3471 = vmatprep.subr.bf16.mxu0 %v3661_v32 }
 0xa2c   :  { %3472 = vmatpush3.bf16.msra.mxu0 %v3661_v32  ;;  %v3680_v32 = vld [vmem:[#allocation3 + $0x240] sm:$0xff]  }
 0xa2f   :  { %3474 = vmatmul.mubr.bf16.vlgmr.msra.gmra.mxu0 %v3662_v33 }
 0xa30   :  { %3477 = vmatprep.mubr.bf16.mxu0 %v3663_v34 }
 0xa37   :  { %3478 = vmatmul.mubr.bf16.gmra.mxu0 %v3664_v35  ;;  %v2817_v35 = vld [vmem:[%s3965_s3 + $0x8] ss:$0 sm:$0xff] }
 0xa38   :  { %3513 = vmatprep.mubr.msk.bf16.mxu0 %vm185_vm1, %v3884_v36 }
 0xacf   :  { %v3411_v37 = vpop.f32.mrf.mxu0 }
 0xad1   :  { %v1623_v38 = vpop.f32.mrf.mxu0 }
 0xad3   :  { %v3412_v39 = vpop.f32.mrf.mxu0 }
 0xad4   :  { %v1655_v47 = vpack.c.bf16 %v3412_v39, %v3411_v37 }
 0xad5   :  { %v1626_v40 = vpop.f32.mrf.mxu0 }
 0xad6   :  { %v1654_v48 = vpack.c.bf16 %v1626_v40, %v1623_v38 }
 0xad7   :  { %v3415_v41 = vpop.f32.mrf.mxu0 }
 0xad9   :  { %v1639_v42 = vpop.f32.mrf.mxu0 }
 0xadb   :  { %v3416_v43 = vpop.f32.mrf.mxu0 }
 0xadc   :  { %v1657_v44 = vpack.c.bf16 %v3416_v43, %v3415_v41 }
 0xadd   :  { %v1642_v45 = vpop.f32.mrf.mxu0 }
 0xade   :  { %v1656_v46 = vpack.c.bf16 %v1642_v45, %v1639_v42  ;;  %3417 = vmatprep.subr.bf16.mxu1 %v1657_v44 }
 0xadf   :  { %3418 = vmatpush3.bf16.msra.mxu1 %v1657_v44 }
 0xae0   :  { %3419 = vmatprep.subr.bf16.mxu1 %v1656_v46 }
 0xae3   :  { %3420 = vmatpush3.bf16.msra.mxu1 %v1656_v46 }
 0xae4   :  { %3421 = vmatprep.subr.bf16.mxu1 %v1655_v47 }
 0xae7   :  { %3422 = vmatpush3.bf16.msra.mxu1 %v1655_v47 }
 0xae8   :  { %3423 = vmatprep.subr.bf16.mxu1 %v1654_v48 }
 0xaeb   :  { %3424 = vmatpush3.bf16.msra.mxu1 %v1654_v48 }
 0xaec   :  { %3433 = vmatprep.subr.bf16.mxu1 %v3665_v49 }
 0xaee   :  { %3426 = vmatmul.mubr.msk.bf16.vlgmr.msra.gmra.mxu1 %vm185_vm1, %v3891_v51 }
 0xaef   :  { %3429 = vmatprep.mubr.msk.bf16.mxu1 %vm185_vm1, %v3898_v52  ;;  %3434 = vmatpush3.bf16.msra.mxu1 %v3665_v49 }
 0xaf0   :  { %3435 = vmatprep.subr.bf16.mxu1 %v3666_v50 }
 0xaf3   :  { %3436 = vmatpush3.bf16.msra.mxu1 %v3666_v50 }
 0xaf4   :  { %3437 = vmatprep.subr.bf16.mxu1 %v3667_v53 }
 0xaf6   :  { %3430 = vmatmul.mubr.msk.bf16.gmra.mxu1 %vm185_vm1, %v3905_v55 }
 0xaf7   :  { %3438 = vmatpush3.bf16.msra.mxu1 %v3667_v53 }
 0xaf8   :  { %3439 = vmatprep.subr.bf16.mxu1 %v3668_v54 }
 0xafb   :  { %3440 = vmatpush3.bf16.msra.mxu1 %v3668_v54 }
 0xafc   :  { %3441 = vmatprep.subr.bf16.mxu1 %v3669_v56 }
 0xaff   :  { %3442 = vmatpush3.bf16.msra.mxu1 %v3669_v56 }
 0xb00   :  { %3443 = vmatprep.subr.bf16.mxu1 %v3670_v57 }
 0xb03   :  { %3444 = vmatpush3.bf16.msra.mxu1 %v3670_v57 }
 0xb04   :  { %3445 = vmatprep.subr.bf16.mxu1 %v3671_v58 }
 0xb07   :  { %3446 = vmatpush3.bf16.msra.mxu1 %v3671_v58 }
 0xb08   :  { %3447 = vmatprep.subr.bf16.mxu1 %v3672_v59 }
 0xb0b   :  { %3448 = vmatpush3.bf16.msra.mxu1 %v3672_v59 }
 0xb0c   :  { %3481 = vmatprep.subr.bf16.mxu1 %v3673_v19 }
 0xbae   :  { %v3427_v60 = vpop.f32.mrf.mxu1 }
 0xbaf   :  { %v1709_v63 = vadd.f32 %v3427_v60, %v2811_v23 }
 0xbb0   :  { %v1700_v20 = vpop.f32.mrf.mxu1 }
 0xbb1   :  { %v1701_v5 = vadd.f32 %v2811_v23, %v1700_v20  ;;  %v1733_v7 = vmax.f32 %v1709_v63, 0.0 }
 0xbb2   :  { %v3428_v61 = vpop.f32.mrf.mxu1 }
 0xbb3   :  { %v1712_v62 = vadd.f32 %v3428_v61, %v2811_v23  ;;  %v1731_v4 = vmax.f32 %v1701_v5, 0.0 }
 0xbb4   :  { %v1703_v0 = vpop.f32.mrf.mxu1 }
 0xbb5   :  { %v1704_v1 = vadd.f32 %v2811_v23, %v1703_v0  ;;  %v1734_v2 = vmax.f32 %v1712_v62, 0.0  ;;  %v3475_v62 = vpop.f32.mrf.mxu0 }
 0xbb6   :  { %v3431_v3 = vpop.f32.mrf.mxu1 }
 0xbb7   :  { %v1732_v6 = vmax.f32 %v1704_v1, 0.0  ;;  %v1740_v10 = vpack.c.bf16 %v1734_v2, %v1733_v7  ;;  %v1725_v15 = vadd.f32 %v3431_v3, %v2811_v23  ;;  %v2041_v63 = vpop.f32.mrf.mxu0 }
 0xbb8   :  { %v1716_v8 = vpop.f32.mrf.mxu1 }
 0xbb9   :  { %v1739_v9 = vpack.c.bf16 %v1732_v6, %v1731_v4  ;;  %v1717_v13 = vadd.f32 %v2811_v23, %v1716_v8  ;;  %v1737_v25 = vmax.f32 %v1725_v15, 0.0  ;;  %v3476_v0 = vpop.f32.mrf.mxu0 }
 0xbba   :  { %v3432_v11 = vpop.f32.mrf.mxu1 }
 0xbbb   :  { %v1728_v14 = vadd.f32 %v3432_v11, %v2811_v23  ;;  %3449 = vmatprep.mubr.bf16.mxu1 %v1739_v9  ;;  %v1735_v22 = vmax.f32 %v1717_v13, 0.0  ;;  %v2044_v1 = vpop.f32.mrf.mxu0 }
 0xbbc   :  { %v1719_v16 = vpop.f32.mrf.mxu1  ;;  %3450 = vmatmul.mubr.bf16.vlgmr.msra.gmra.mxu1 %v1740_v10 }
 0xbbd   :  { %v1720_v17 = vadd.f32 %v2811_v23, %v1719_v16  ;;  %3482 = vmatpush3.bf16.msra.mxu1 %v3673_v19  ;;  %v1738_v18 = vmax.f32 %v1728_v14, 0.0  ;;  %v3479_v3 = vpop.f32.mrf.mxu0 }
 0xbbe   :  { %3483 = vmatprep.subr.bf16.mxu1 %v3674_v12 }
 0xbbf   :  { %v1736_v24 = vmax.f32 %v1720_v17, 0.0  ;;  %v1742_v27 = vpack.c.bf16 %v1738_v18, %v1737_v25  ;;  %v2057_v7 = vpop.f32.mrf.mxu0 }
 0xbc1   :  { %v1741_v26 = vpack.c.bf16 %v1736_v24, %v1735_v22  ;;  %3484 = vmatpush3.bf16.msra.mxu1 %v3674_v12  ;;  %v3480_v10 = vpop.f32.mrf.mxu0 }
 0xbc2   :  { %3485 = vmatprep.subr.bf16.mxu1 %v3675_v21 }
 0xbc3   :  { %3453 = vmatprep.mubr.bf16.mxu1 %v1741_v26  ;;  %v2060_v15 = vpop.f32.mrf.mxu0 }
 0xbc4   :  { %3454 = vmatmul.mubr.bf16.gmra.mxu1 %v1742_v27 }
 0xbc5   :  { %3486 = vmatpush3.bf16.msra.mxu1 %v3675_v21 }
 0xbc6   :  { %3487 = vmatprep.subr.bf16.mxu1 %v3676_v28 }
 0xbc9   :  { %3488 = vmatpush3.bf16.msra.mxu1 %v3676_v28 }
 0xbca   :  { %3489 = vmatprep.subr.bf16.mxu1 %v3677_v29 }
 0xbcd   :  { %3490 = vmatpush3.bf16.msra.mxu1 %v3677_v29  ;;  %v3681_v29 = vld [vmem:[#allocation3 + $0x2f8] sm:$0xff]  }
 0xbce   :  { %3491 = vmatprep.subr.bf16.mxu1 %v3678_v30 }
 0xbd1   :  { %3492 = vmatpush3.bf16.msra.mxu1 %v3678_v30  ;;  %v3682_v30 = vld [vmem:[#allocation3 + $0x2f0] sm:$0xff]  }
 0xbd2   :  { %3493 = vmatprep.subr.bf16.mxu1 %v3679_v31 }
 0xbd5   :  { %3494 = vmatpush3.bf16.msra.mxu1 %v3679_v31  ;;  %v3683_v31 = vld [vmem:[#allocation3 + $0x2e8] sm:$0xff]  }
 0xbd6   :  { %3495 = vmatprep.subr.bf16.mxu1 %v3680_v32 }
 0xbd9   :  { %3496 = vmatpush3.bf16.msra.mxu1 %v3680_v32  ;;  %v3684_v32 = vld [vmem:[#allocation3 + $0x2e0] sm:$0xff]  }
 0xc7c   :  { %v3451_v33 = vpop.f32.mrf.mxu1 }
 0xc7d   :  { %v1859_v40 = vadd.f32 %v3451_v33, %v2817_v35  ;;  %v3685_v33 = vld [vmem:[#allocation3 + $0x2d8] sm:$0xff]  }
 0xc7e   :  { %v1850_v34 = vpop.f32.mrf.mxu1 }
 0xc7f   :  { %v1851_v38 = vadd.f32 %v2817_v35, %v1850_v34  ;;  %v1883_v47 = vmax.f32 %v1859_v40, 0.0  ;;  %v3686_v34 = vld [vmem:[#allocation3 + $0x2d0] sm:$0xff]   ;;  %v2847_v40 = vld [vmem:[%s3965_s3 + $0x9] ss:$0 sm:$0xff] }
 0xc80   :  { %v3452_v37 = vpop.f32.mrf.mxu1 }
 0xc81   :  { %v1862_v39 = vadd.f32 %v3452_v37, %v2817_v35  ;;  %v1881_v45 = vmax.f32 %v1851_v38, 0.0  ;;  %v3688_v37 = vld [vmem:[#allocation3 + $0x2c0] sm:$0xff]  }
 0xc82   :  { %v1853_v41 = vpop.f32.mrf.mxu1 }
 0xc83   :  { %v1854_v42 = vadd.f32 %v2817_v35, %v1853_v41  ;;  %v1884_v43 = vmax.f32 %v1862_v39, 0.0 }
 0xc84   :  { %v3455_v44 = vpop.f32.mrf.mxu1 }
 0xc85   :  { %v1882_v46 = vmax.f32 %v1854_v42, 0.0  ;;  %v1890_v50 = vpack.c.bf16 %v1884_v43, %v1883_v47  ;;  %v1875_v57 = vadd.f32 %v3455_v44, %v2817_v35 }
 0xc86   :  { %v1866_v48 = vpop.f32.mrf.mxu1 }
 0xc87   :  { %v1889_v49 = vpack.c.bf16 %v1882_v46, %v1881_v45  ;;  %v1867_v54 = vadd.f32 %v2817_v35, %v1866_v48  ;;  %v1887_v23 = vmax.f32 %v1875_v57, 0.0 }
 0xc88   :  { %v3456_v53 = vpop.f32.mrf.mxu1 }
 0xc89   :  { %v1878_v56 = vadd.f32 %v3456_v53, %v2817_v35  ;;  %3497 = vmatprep.mubr.bf16.mxu1 %v1889_v49  ;;  %v1885_v60 = vmax.f32 %v1867_v54, 0.0 }
 0xc8a   :  { %v1869_v58 = vpop.f32.mrf.mxu1  ;;  %3498 = vmatmul.mubr.bf16.vlgmr.msra.gmra.mxu1 %v1890_v50 }
 0xc8b   :  { %v1870_v59 = vadd.f32 %v2817_v35, %v1869_v58  ;;  %v1888_v19 = vmax.f32 %v1878_v56, 0.0  ;;  %v3687_v35 = vld [vmem:[#allocation3 + $0x2c8] sm:$0xff]  }
 0xc8d   :  { %v1886_v20 = vmax.f32 %v1870_v59, 0.0  ;;  %v1892_v5 = vpack.c.bf16 %v1888_v19, %v1887_v23 }
 0xc8f   :  { %v1891_v61 = vpack.c.bf16 %v1886_v20, %v1885_v60 }
 0xc91   :  { %3501 = vmatprep.mubr.bf16.mxu1 %v1891_v61 }
 0xc92   :  { %3502 = vmatmul.mubr.bf16.gmra.mxu1 %v1892_v5 }
 0xc93   :  { %3553 = vmatprep.mubr.msk.bf16.mxu1 %vm185_vm1, %v3884_v36 }
 0xd4a   :  { %v3499_v2 = vpop.f32.mrf.mxu1 }
 0xd4b   :  { %v2163_v24 = vadd.f32 %v3499_v2, %v3475_v62 }
 0xd4c   :  { %v2154_v4 = vpop.f32.mrf.mxu1 }
 0xd4d   :  { %v2155_v27 = vadd.f32 %v2154_v4, %v2041_v63 }
 0xd4e   :  { %v3500_v6 = vpop.f32.mrf.mxu1 }
 0xd4f   :  { %v2166_v21 = vadd.f32 %v3500_v6, %v3476_v0 }
 0xd50   :  { %v2157_v8 = vpop.f32.mrf.mxu1 }
 0xd51   :  { %v2186_v25 = vpack.c.bf16 %v2166_v21, %v2163_v24  ;;  %v2158_v26 = vadd.f32 %v2157_v8, %v2044_v1  ;;  %v3694_v21 = vld [vmem:[#allocation3 + $0x310] sm:$0xff]  }
 0xd52   :  { %v3503_v9 = vpop.f32.mrf.mxu1 }
 0xd53   :  { %v2179_v13 = vadd.f32 %v3503_v9, %v3479_v3  ;;  %v2185_v28 = vpack.c.bf16 %v2158_v26, %v2155_v27 }
 0xd54   :  { %v2170_v11 = vpop.f32.mrf.mxu1 }
 0xd55   :  { %v2171_v17 = vadd.f32 %v2170_v11, %v2057_v7 }
 0xd56   :  { %v3504_v12 = vpop.f32.mrf.mxu1 }
 0xd57   :  { %v2182_v14 = vadd.f32 %v3504_v12, %v3480_v10 }
 0xd58   :  { %v2173_v16 = vpop.f32.mrf.mxu1 }
 0xd59   :  { %v2188_v36 = vpack.c.bf16 %v2182_v14, %v2179_v13  ;;  %v2174_v18 = vadd.f32 %v2173_v16, %v2060_v15  ;;  %v3689_v15 = vld [vmem:[#allocation3 + $0x338] sm:$0xff]   ;;  %v3690_v16 = vld [vmem:[#allocation3 + $0x330] sm:$0xff]  }
 0xd5b   :  { %v2187_v22 = vpack.c.bf16 %v2174_v18, %v2171_v17  ;;  %3505 = vmatprep.subr.bf16.mxu0 %v2188_v36  ;;  %v3691_v17 = vld [vmem:[#allocation3 + $0x328] sm:$0xff]   ;;  %v3693_v18 = vld [vmem:[#allocation3 + $0x318] sm:$0xff]  }
 0xd5c   :  { %3506 = vmatpush3.bf16.msra.mxu0 %v2188_v36  ;;  %v3692_v36 = vld [vmem:[#allocation3 + $0x320] sm:$0xff]  }
 0xd5d   :  { %3507 = vmatprep.subr.bf16.mxu0 %v2187_v22 }
 0xd60   :  { %3508 = vmatpush3.bf16.msra.mxu0 %v2187_v22 }
 0xd61   :  { %3509 = vmatprep.subr.bf16.mxu0 %v2186_v25 }
 0xd64   :  { %3510 = vmatpush3.bf16.msra.mxu0 %v2186_v25 }
 0xd65   :  { %3511 = vmatprep.subr.bf16.mxu0 %v2185_v28 }
 0xd68   :  { %3512 = vmatpush3.bf16.msra.mxu0 %v2185_v28 }
 0xd69   :  { %3521 = vmatprep.subr.bf16.mxu0 %v3681_v29 }
 0xd6b   :  { %3514 = vmatmul.mubr.msk.bf16.vlgmr.msra.gmra.mxu0 %vm185_vm1, %v3891_v51 }
 0xd6c   :  { %3517 = vmatprep.mubr.msk.bf16.mxu0 %vm185_vm1, %v3898_v52  ;;  %3522 = vmatpush3.bf16.msra.mxu0 %v3681_v29 }
 0xd6d   :  { %3523 = vmatprep.subr.bf16.mxu0 %v3682_v30 }
 0xd70   :  { %3524 = vmatpush3.bf16.msra.mxu0 %v3682_v30 }
 0xd71   :  { %3525 = vmatprep.subr.bf16.mxu0 %v3683_v31 }
 0xd73   :  { %3518 = vmatmul.mubr.msk.bf16.gmra.mxu0 %vm185_vm1, %v3905_v55 }
 0xd74   :  { %3526 = vmatpush3.bf16.msra.mxu0 %v3683_v31 }
 0xd75   :  { %3527 = vmatprep.subr.bf16.mxu0 %v3684_v32 }
 0xd78   :  { %3528 = vmatpush3.bf16.msra.mxu0 %v3684_v32 }
 0xd79   :  { %3529 = vmatprep.subr.bf16.mxu0 %v3685_v33 }
 0xd7c   :  { %3530 = vmatpush3.bf16.msra.mxu0 %v3685_v33 }
 0xd7d   :  { %3531 = vmatprep.subr.bf16.mxu0 %v3686_v34 }
 0xd80   :  { %3532 = vmatpush3.bf16.msra.mxu0 %v3686_v34 }
 0xd81   :  { %3533 = vmatprep.subr.bf16.mxu0 %v3687_v35 }
 0xd84   :  { %3534 = vmatpush3.bf16.msra.mxu0 %v3687_v35 }
 0xd85   :  { %3535 = vmatprep.subr.bf16.mxu0 %v3688_v37 }
 0xd88   :  { %3536 = vmatpush3.bf16.msra.mxu0 %v3688_v37 }
 0xe2b   :  { %v3515_v38 = vpop.f32.mrf.mxu0 }
 0xe2c   :  { %v2240_v44 = vadd.f32 %v3515_v38, %v2847_v40 }
 0xe2d   :  { %v2231_v39 = vpop.f32.mrf.mxu0 }
 0xe2e   :  { %v2232_v42 = vadd.f32 %v2847_v40, %v2231_v39  ;;  %v2264_v53 = vmax.f32 %v2240_v44, 0.0 }
 0xe2f   :  { %v3516_v41 = vpop.f32.mrf.mxu0 }
 0xe30   :  { %v2243_v43 = vadd.f32 %v3516_v41, %v2847_v40  ;;  %v2262_v49 = vmax.f32 %v2232_v42, 0.0 }
 0xe31   :  { %v2234_v45 = vpop.f32.mrf.mxu0 }
 0xe32   :  { %v2235_v46 = vadd.f32 %v2847_v40, %v2234_v45  ;;  %v2265_v47 = vmax.f32 %v2243_v43, 0.0 }
 0xe33   :  { %v3519_v48 = vpop.f32.mrf.mxu0 }
 0xe34   :  { %v2263_v50 = vmax.f32 %v2235_v46, 0.0  ;;  %v2271_v57 = vpack.c.bf16 %v2265_v47, %v2264_v53  ;;  %v2256_v60 = vadd.f32 %v3519_v48, %v2847_v40 }
 0xe35   :  { %v2247_v54 = vpop.f32.mrf.mxu0 }
 0xe36   :  { %v2270_v56 = vpack.c.bf16 %v2263_v50, %v2262_v49  ;;  %v2248_v59 = vadd.f32 %v2847_v40, %v2247_v54  ;;  %v2268_v63 = vmax.f32 %v2256_v60, 0.0  ;;  %v2867_v54 = vld [vmem:[%s3965_s3 + $0xb] ss:$0 sm:$0xff] }
 0xe37   :  { %v3520_v58 = vpop.f32.mrf.mxu0 }
 0xe38   :  { %v2259_v19 = vadd.f32 %v3520_v58, %v2847_v40  ;;  %3537 = vmatprep.mubr.bf16.mxu0 %v2270_v56  ;;  %v2266_v5 = vmax.f32 %v2248_v59, 0.0 }
 0xe39   :  { %v2250_v20 = vpop.f32.mrf.mxu0  ;;  %3538 = vmatmul.mubr.bf16.vlgmr.msra.gmra.mxu0 %v2271_v57 }
 0xe3a   :  { %v2251_v23 = vadd.f32 %v2847_v40, %v2250_v20  ;;  %v2269_v61 = vmax.f32 %v2259_v19, 0.0 }
 0xe3c   :  { %v2267_v62 = vmax.f32 %v2251_v23, 0.0  ;;  %v2273_v1 = vpack.c.bf16 %v2269_v61, %v2268_v63 }
 0xe3e   :  { %v2272_v0 = vpack.c.bf16 %v2267_v62, %v2266_v5 }
 0xe40   :  { %3541 = vmatprep.mubr.bf16.mxu0 %v2272_v0 }
 0xe41   :  { %3542 = vmatmul.mubr.bf16.gmra.mxu0 %v2273_v1 }
 0xef9   :  { %v3539_v2 = vpop.f32.mrf.mxu0 }
 0xefb   :  { %v2373_v3 = vpop.f32.mrf.mxu0 }
 0xefd   :  { %v3540_v4 = vpop.f32.mrf.mxu0 }
 0xefe   :  { %v2405_v13 = vpack.c.bf16 %v3540_v4, %v3539_v2 }
 0xeff   :  { %v2376_v6 = vpop.f32.mrf.mxu0 }
 0xf00   :  { %v2404_v14 = vpack.c.bf16 %v2376_v6, %v2373_v3 }
 0xf01   :  { %v3543_v7 = vpop.f32.mrf.mxu0 }
 0xf03   :  { %v2389_v8 = vpop.f32.mrf.mxu0 }
 0xf05   :  { %v3544_v9 = vpop.f32.mrf.mxu0 }
 0xf06   :  { %v2407_v10 = vpack.c.bf16 %v3544_v9, %v3543_v7 }
 0xf07   :  { %v2392_v11 = vpop.f32.mrf.mxu0 }
 0xf08   :  { %v2406_v12 = vpack.c.bf16 %v2392_v11, %v2389_v8  ;;  %3545 = vmatprep.subr.bf16.mxu1 %v2407_v10 }
 0xf09   :  { %3546 = vmatpush3.bf16.msra.mxu1 %v2407_v10 }
 0xf0a   :  { %3547 = vmatprep.subr.bf16.mxu1 %v2406_v12 }
 0xf0d   :  { %3548 = vmatpush3.bf16.msra.mxu1 %v2406_v12 }
 0xf0e   :  { %3549 = vmatprep.subr.bf16.mxu1 %v2405_v13 }
 0xf11   :  { %3550 = vmatpush3.bf16.msra.mxu1 %v2405_v13 }
 0xf12   :  { %3551 = vmatprep.subr.bf16.mxu1 %v2404_v14 }
 0xf15   :  { %3552 = vmatpush3.bf16.msra.mxu1 %v2404_v14 }
 0xf16   :  { %3561 = vmatprep.subr.bf16.mxu1 %v3689_v15 }
 0xf18   :  { %3554 = vmatmul.mubr.msk.bf16.vlgmr.msra.gmra.mxu1 %vm185_vm1, %v3891_v51  ;;  %v3695_v51 = vld [vmem:[#allocation3 + $0x308] sm:$0xff]  }
 0xf19   :  { %3557 = vmatprep.mubr.msk.bf16.mxu1 %vm185_vm1, %v3898_v52  ;;  %3562 = vmatpush3.bf16.msra.mxu1 %v3689_v15  ;;  %v3696_v52 = vld [vmem:[#allocation3 + $0x300] sm:$0xff]  }
 0xf1a   :  { %3563 = vmatprep.subr.bf16.mxu1 %v3690_v16 }
 0xf1d   :  { %3564 = vmatpush3.bf16.msra.mxu1 %v3690_v16 }
 0xf1e   :  { %3565 = vmatprep.subr.bf16.mxu1 %v3691_v17 }
 0xf20   :  { %3558 = vmatmul.mubr.msk.bf16.gmra.mxu1 %vm185_vm1, %v3905_v55  ;;  %v2861_v55 = vld [vmem:[%s3965_s3 + $0xa] ss:$0 sm:$0xff] }
 0xf21   :  { %3566 = vmatpush3.bf16.msra.mxu1 %v3691_v17 }
 0xf22   :  { %3567 = vmatprep.subr.bf16.mxu1 %v3692_v36 }
 0xf25   :  { %3568 = vmatpush3.bf16.msra.mxu1 %v3692_v36 }
 0xf26   :  { %3569 = vmatprep.subr.bf16.mxu1 %v3693_v18 }
 0xf29   :  { %3570 = vmatpush3.bf16.msra.mxu1 %v3693_v18 }
 0xf2a   :  { %3571 = vmatprep.subr.bf16.mxu1 %v3694_v21 }
 0xf2d   :  { %3572 = vmatpush3.bf16.msra.mxu1 %v3694_v21 }
 0xf2e   :  { %3573 = vmatprep.subr.bf16.mxu1 %v3695_v51 }
 0xf31   :  { %3574 = vmatpush3.bf16.msra.mxu1 %v3695_v51 }
 0xf32   :  { %3575 = vmatprep.subr.bf16.mxu1 %v3696_v52 }
 0xf35   :  { %3576 = vmatpush3.bf16.msra.mxu1 %v3696_v52 }
 0xfd8   :  { %v3555_v22 = vpop.f32.mrf.mxu1 }
 0xfd9   :  { %v2459_v28 = vadd.f32 %v3555_v22, %v2861_v55 }
 0xfda   :  { %v2450_v24 = vpop.f32.mrf.mxu1 }
 0xfdb   :  { %v2451_v26 = vadd.f32 %v2861_v55, %v2450_v24  ;;  %v2483_v35 = vmax.f32 %v2459_v28, 0.0 }
 0xfdc   :  { %v3556_v25 = vpop.f32.mrf.mxu1 }
 0xfdd   :  { %v2462_v27 = vadd.f32 %v3556_v25, %v2861_v55  ;;  %v2481_v33 = vmax.f32 %v2451_v26, 0.0 }
 0xfde   :  { %v2453_v29 = vpop.f32.mrf.mxu1 }
 0xfdf   :  { %v2454_v30 = vadd.f32 %v2861_v55, %v2453_v29  ;;  %v2484_v31 = vmax.f32 %v2462_v27, 0.0 }
 0xfe0   :  { %v3559_v32 = vpop.f32.mrf.mxu1 }
 0xfe1   :  { %v2482_v34 = vmax.f32 %v2454_v30, 0.0  ;;  %v2490_v39 = vpack.c.bf16 %v2484_v31, %v2483_v35  ;;  %v2475_v43 = vadd.f32 %v3559_v32, %v2861_v55 }
 0xfe2   :  { %v2466_v37 = vpop.f32.mrf.mxu1 }
 0xfe3   :  { %v2489_v38 = vpack.c.bf16 %v2482_v34, %v2481_v33  ;;  %v2467_v41 = vadd.f32 %v2861_v55, %v2466_v37  ;;  %v2487_v49 = vmax.f32 %v2475_v43, 0.0 }
 0xfe4   :  { %v3560_v40 = vpop.f32.mrf.mxu1 }
 0xfe5   :  { %v2478_v42 = vadd.f32 %v3560_v40, %v2861_v55  ;;  %3577 = vmatprep.mubr.bf16.mxu1 %v2489_v38  ;;  %v2485_v47 = vmax.f32 %v2467_v41, 0.0 }
 0xfe6   :  { %v2469_v44 = vpop.f32.mrf.mxu1  ;;  %3578 = vmatmul.mubr.bf16.vlgmr.msra.gmra.mxu1 %v2490_v39 }
 0xfe7   :  { %v2470_v45 = vadd.f32 %v2861_v55, %v2469_v44  ;;  %v2488_v46 = vmax.f32 %v2478_v42, 0.0 }
 0xfe9   :  { %v2486_v48 = vmax.f32 %v2470_v45, 0.0  ;;  %v2492_v53 = vpack.c.bf16 %v2488_v46, %v2487_v49 }
 0xfeb   :  { %v2491_v50 = vpack.c.bf16 %v2486_v48, %v2485_v47 }
 0xfed   :  { %3581 = vmatprep.mubr.bf16.mxu1 %v2491_v50 }
 0xfee   :  { %3582 = vmatmul.mubr.bf16.gmra.mxu1 %v2492_v53 }
0x10a6   :  { %v3579_v56 = vpop.f32.mrf.mxu1 }
0x10a7   :  { %v2609_v57 = vadd.f32 %v3579_v56, %v2867_v54 }
0x10a8   :  { %v2600_v58 = vpop.f32.mrf.mxu1 }
0x10a9   :  { %v2878_v59 = vmul.f32 -1.442695, %v2609_v57  ;;  %v2601_v19 = vadd.f32 %v2867_v54, %v2600_v58 }
0x10aa   :  { %v3580_v60 = vpop.f32.mrf.mxu1 }
0x10ab   :  { %3697 = vpow2.f32 %v2878_v59  ;;  %v2876_v20 = vmul.f32 -1.442695, %v2601_v19  ;;  %v2612_v23 = vadd.f32 %v3580_v60, %v2867_v54 }
0x10ac   :  { %v2603_v61 = vpop.f32.mrf.mxu1 }
0x10ad   :  { %3699 = vpow2.f32 %v2876_v20  ;;  %v2879_v5 = vmul.f32 -1.442695, %v2612_v23  ;;  %v2604_v62 = vadd.f32 %v2867_v54, %v2603_v61 }
0x10ae   :  { %v3583_v63 = vpop.f32.mrf.mxu1 }
0x10af   :  { %3701 = vpow2.f32 %v2879_v5  ;;  %v2877_v0 = vmul.f32 -1.442695, %v2604_v62  ;;  %v2625_v1 = vadd.f32 %v3583_v63, %v2867_v54 }
0x10b0   :  { %v2616_v2 = vpop.f32.mrf.mxu1 }
0x10b1   :  { %3703 = vpow2.f32 %v2877_v0  ;;  %v2882_v3 = vmul.f32 -1.442695, %v2625_v1  ;;  %v2617_v4 = vadd.f32 %v2867_v54, %v2616_v2 }
0x10b2   :  { %v3584_v6 = vpop.f32.mrf.mxu1 }
0x10b3   :  { %3705 = vpow2.f32 %v2882_v3  ;;  %v2880_v7 = vmul.f32 -1.442695, %v2617_v4  ;;  %v2628_v8 = vadd.f32 %v3584_v6, %v2867_v54 }
0x10b4   :  { %v2619_v9 = vpop.f32.mrf.mxu1 }
0x10b5   :  { %3707 = vpow2.f32 %v2880_v7  ;;  %v2883_v10 = vmul.f32 -1.442695, %v2628_v8  ;;  %v2620_v11 = vadd.f32 %v2867_v54, %v2619_v9 }
0x10b7   :  { %3709 = vpow2.f32 %v2883_v10  ;;  %v2881_v12 = vmul.f32 -1.442695, %v2620_v11 }
0x10b8   :  { %v3698_v13 = vpop.eup %3697 }
0x10b9   :  { %v2657_v14 = vadd.f32 1.0, %v3698_v13  ;;  %3711 = vpow2.f32 %v2881_v12 }
0x10ba   :  { %v3700_v15 = vpop.eup %3699 }
0x10bb   :  { %3713 = vrcp.f32 %v2657_v14  ;;  %v2655_v16 = vadd.f32 1.0, %v3700_v15 }
0x10bc   :  { %v3702_v17 = vpop.eup %3701 }
0x10bd   :  { %3715 = vrcp.f32 %v2655_v16  ;;  %v2658_v36 = vadd.f32 1.0, %v3702_v17 }
0x10be   :  { %v3704_v18 = vpop.eup %3703 }
0x10bf   :  { %3717 = vrcp.f32 %v2658_v36  ;;  %v2656_v21 = vadd.f32 1.0, %v3704_v18 }
0x10c0   :  { %v3706_v51 = vpop.eup %3705 }
0x10c1   :  { %3719 = vrcp.f32 %v2656_v21  ;;  %v2661_v52 = vadd.f32 1.0, %v3706_v51 }
0x10c2   :  { %v3708_v22 = vpop.eup %3707 }
0x10c3   :  { %3721 = vrcp.f32 %v2661_v52  ;;  %v2659_v24 = vadd.f32 1.0, %v3708_v22 }
0x10c4   :  { %v3710_v55 = vpop.eup %3709 }
0x10c5   :  { %3723 = vrcp.f32 %v2659_v24  ;;  %v2662_v25 = vadd.f32 1.0, %v3710_v55 }
0x10c6   :  { %v3712_v26 = vpop.eup %3711 }
0x10c7   :  { %3725 = vrcp.f32 %v2662_v25  ;;  %v2660_v27 = vadd.f32 1.0, %v3712_v26 }
0x10c8   :  { %v3714_v28 = vpop.eup %3713 }
0x10c9   :  { %2681 = vst [vmem:[%s3966_s4 + $0x10] sm:$0xff] %v3714_v28  ;;  %3727 = vrcp.f32 %v2660_v27 }
0x10ca   :  { %v3716_v29 = vpop.eup %3715 }
0x10cb   :  { %2679 = vst [vmem:[%s3966_s4] sm:$0xff] %v3716_v29 }
0x10cc   :  { %v3718_v30 = vpop.eup %3717 }
0x10cd   :  { %2682 = vst [vmem:[%s3966_s4 + $0x18] sm:$0xff] %v3718_v30 }
0x10ce   :  { %v3720_v31 = vpop.eup %3719 }
0x10cf   :  { %2680 = vst [vmem:[%s3966_s4 + $0x8] sm:$0xff] %v3720_v31 }
0x10d0   :  { %v3722_v32 = vpop.eup %3721 }
0x10d1   :  { %2685 = vst [vmem:[%s3966_s4 + $0x30] sm:$0xff] %v3722_v32 }
0x10d2   :  { %v3724_v33 = vpop.eup %3723 }
0x10d3   :  { %2683 = vst [vmem:[%s3966_s4 + $0x20] sm:$0xff] %v3724_v33 }
0x10d4   :  { %v3726_v34 = vpop.eup %3725 }
0x10d5   :  { %2686 = vst [vmem:[%s3966_s4 + $0x38] sm:$0xff] %v3726_v34 }
0x10d6   :  { %v3728_v35 = vpop.eup %3727 }
0x10d7   :  { %2684 = vst [vmem:[%s3966_s4 + $0x28] sm:$0xff] %v3728_v35 }
0x10d8   :  { %2691 = vsyncpa [#allocation4], 1 }

</bundles_post_ra>
